<compile_context>
chip_gen: v7x
topology: tpu7x:2x2x1
jax: 0.10.0
libtpu: 0.0.40
codegen_flags: <defaults>
</compile_context>

<pallas_src>
import jax
import jax.numpy as jnp
from jax import lax
from jax.experimental import pallas as pl
from jax.experimental.pallas import tpu as pltpu  # noqa: F401  (TPU backend)

EPS = 1e-3


def _make_bn_kernel(activation=None):
    def _bn_kernel(x_ref, params_ref, o_ref):
        # x_ref: (N, C, R) slab in VMEM (C on sublanes, R=H*W on lanes).
        # params_ref: (C, 2) with gamma in column 0, beta in column 1.
        n, c, r = x_ref.shape
        inv_cnt = 1.0 / float(n * r)

        # ---- Pass 1: per-channel sum / sum-of-squares (lane reductions). ----
        x = x_ref[...].astype(jnp.float32)
        s1 = jnp.sum(x, axis=-1, keepdims=True)        # (N, C, 1)
        s2 = jnp.sum(x * x, axis=-1, keepdims=True)    # (N, C, 1)
        if n > 1:                                      # static; no-op for N=1
            s1 = jnp.sum(s1, axis=0, keepdims=True)    # (1, C, 1)
            s2 = jnp.sum(s2, axis=0, keepdims=True)

        mean = s1 * inv_cnt
        # Clamp: E[x^2] - E[x]^2 can go slightly negative in f32 over few samples.
        var = jnp.maximum(s2 * inv_cnt - mean * mean, 0.0)
        inv_std = lax.rsqrt(var + EPS)                 # EUP slot, effectively free

        # Fold affine + normalization into a per-channel scale/shift.
        p = params_ref[...].astype(jnp.float32)        # (C, 2)
        g = p[:, 0:1][None]                            # (1, C, 1)
        b = p[:, 1:2][None]                            # (1, C, 1)
        scale = g * inv_std
        shift = b - mean * scale

        # ---- Pass 2: re-load x from VMEM (drops x's live range -> no spills). --
        y = x_ref[...].astype(jnp.float32) * scale + shift
        if activation is not None:
            y = activation(y)                          # fusion hook for consumers
        o_ref[...] = y.astype(o_ref.dtype)

    return _bn_kernel


def batchnorm2d_pallas(x_nchw, gamma, beta, activation=None):
    """x_nchw: (N, C, H, W); gamma, beta: (C,). Returns NCHW output."""
    N, C, H, W = x_nchw.shape
    R = H * W

    # Zero-copy reshape for any N: NCHW -> (N, C, H*W). No wrapper transposes.
    x3d = x_nchw.reshape(N, C, R)

    # Single packed per-channel parameter input (gamma | beta).
    params = jnp.stack(
        [gamma.astype(jnp.float32), beta.astype(jnp.float32)], axis=1
    )                                                  # (C, 2)

    # Whole-array blocks, no grid: the full slab (~67 KB for the spec shape)
    # lives in VMEM for the single kernel invocation. Launch overhead dominates,
    # so no grid / dimension_semantics / multi-core sharding is added.
    out3d = pl.pallas_call(
        _make_bn_kernel(activation),
        out_shape=jax.ShapeDtypeStruct((N, C, R), x_nchw.dtype),
        cost_estimate=pl.CostEstimate(
            flops=7 * N * C * R,
            transcendentals=C,
            bytes_accessed=2 * N * C * R * 4 + 2 * C * 4,
        ),
    )(x3d, params)

    return out3d.reshape(N, C, H, W)                   # zero-copy reshape back


def _reference(x_nchw, gamma, beta):
    mean = jnp.mean(x_nchw, axis=(0, 2, 3), keepdims=True)
    var = jnp.mean((x_nchw - mean) ** 2, axis=(0, 2, 3), keepdims=True)
    return (x_nchw - mean) * lax.rsqrt(var + EPS) * gamma.reshape(1, -1, 1, 1) \
        + beta.reshape(1, -1, 1, 1)


if __name__ == "__main__":
    key = jax.random.PRNGKey(0)
    kx, kg, kb = jax.random.split(key, 3)

    N, C, H, W = 1, 344, 7, 7  # shapes implied by the module's forward
    x = jax.random.normal(kx, (N, C, H, W), dtype=jnp.float32)
    # PyTorch default affine params are ones/zeros; use non-trivial values to
    # exercise the affine path deterministically.
    gamma = 1.0 + 0.1 * jax.random.normal(kg, (C,), dtype=jnp.float32)
    beta = 0.1 * jax.random.normal(kb, (C,), dtype=jnp.float32)

    out = batchnorm2d_pallas(x, gamma, beta)
    jax.block_until_ready(out)

    ref = _reference(x, gamma, beta)
    assert out.shape == (N, C, H, W)
    assert jnp.allclose(out, ref, atol=1e-4, rtol=1e-4)

    print("KERNEL_OK")
</pallas_src>

<mosaic_0001>
module attributes {stable_mosaic.version = 11 : i64} {
  func.func @_bn_kernel(%arg0: memref<1x344x49xf32, #tpu.memory_space<vmem>>, %arg1: memref<344x2xf32, #tpu.memory_space<vmem>>, %arg2: memref<1x344x49xf32, #tpu.memory_space<vmem>>) attributes {dimension_semantics = [], scalar_prefetch = 0 : i64, scratch_operands = 0 : i64, tpu.core_type = #tpu.core_type<tc>} {
    %c0 = arith.constant 0 : index
    %c0_0 = arith.constant 0 : index
    %c0_1 = arith.constant 0 : index
    %0 = vector.load %arg0[%c0, %c0_0, %c0_1] : memref<1x344x49xf32, #tpu.memory_space<vmem>>, vector<1x344x49xf32>
    %cst = arith.constant dense<0.000000e+00> : vector<1x344xf32>
    %1 = vector.multi_reduction <add>, %0, %cst [2] : vector<1x344x49xf32> to vector<1x344xf32>
    %2 = vector.shape_cast %1 : vector<1x344xf32> to vector<1x344x1xf32>
    %3 = arith.mulf %0, %0 : vector<1x344x49xf32>
    %cst_2 = arith.constant dense<0.000000e+00> : vector<1x344xf32>
    %4 = vector.multi_reduction <add>, %3, %cst_2 [2] : vector<1x344x49xf32> to vector<1x344xf32>
    %5 = vector.shape_cast %4 : vector<1x344xf32> to vector<1x344x1xf32>
    %cst_3 = arith.constant 0.0204081628 : f32
    %6 = vector.broadcast %cst_3 : f32 to vector<1x344x1xf32>
    %7 = arith.mulf %2, %6 : vector<1x344x1xf32>
    %cst_4 = arith.constant 0.0204081628 : f32
    %8 = vector.broadcast %cst_4 : f32 to vector<1x344x1xf32>
    %9 = arith.mulf %5, %8 : vector<1x344x1xf32>
    %10 = arith.mulf %7, %7 : vector<1x344x1xf32>
    %11 = arith.subf %9, %10 : vector<1x344x1xf32>
    %cst_5 = arith.constant 0.000000e+00 : f32
    %12 = vector.broadcast %cst_5 : f32 to vector<1x344x1xf32>
    %13 = arith.maximumf %11, %12 : vector<1x344x1xf32>
    %cst_6 = arith.constant 1.000000e-03 : f32
    %14 = vector.broadcast %cst_6 : f32 to vector<1x344x1xf32>
    %15 = arith.addf %13, %14 : vector<1x344x1xf32>
    %16 = math.rsqrt %15 : vector<1x344x1xf32>
    %c0_7 = arith.constant 0 : index
    %c0_8 = arith.constant 0 : index
    %17 = vector.load %arg1[%c0_7, %c0_8] : memref<344x2xf32, #tpu.memory_space<vmem>>, vector<344x2xf32>
    %18 = vector.extract_strided_slice %17 {offsets = [0, 0], sizes = [344, 1], strides = [1, 1]} : vector<344x2xf32> to vector<344x1xf32>
    %19 = vector.shape_cast %18 : vector<344x1xf32> to vector<1x344x1xf32>
    %20 = vector.extract_strided_slice %17 {offsets = [0, 1], sizes = [344, 1], strides = [1, 1]} : vector<344x2xf32> to vector<344x1xf32>
    %21 = vector.shape_cast %20 : vector<344x1xf32> to vector<1x344x1xf32>
    %22 = arith.mulf %19, %16 : vector<1x344x1xf32>
    %23 = arith.mulf %7, %22 : vector<1x344x1xf32>
    %24 = arith.subf %21, %23 : vector<1x344x1xf32>
    %c0_9 = arith.constant 0 : index
    %c0_10 = arith.constant 0 : index
    %c0_11 = arith.constant 0 : index
    %25 = vector.load %arg0[%c0_9, %c0_10, %c0_11] : memref<1x344x49xf32, #tpu.memory_space<vmem>>, vector<1x344x49xf32>
    %26 = vector.broadcast %22 : vector<1x344x1xf32> to vector<1x344x49xf32>
    %27 = arith.mulf %25, %26 : vector<1x344x49xf32>
    %28 = vector.broadcast %24 : vector<1x344x1xf32> to vector<1x344x49xf32>
    %29 = arith.addf %27, %28 : vector<1x344x49xf32>
    %c0_12 = arith.constant 0 : index
    %c0_13 = arith.constant 0 : index
    %c0_14 = arith.constant 0 : index
    %30 = vector.load %arg2[%c0_12, %c0_13, %c0_14] : memref<1x344x49xf32, #tpu.memory_space<vmem>>, vector<1x344x49xf32>
    tpu.vector_store %arg2[%c0_12, %c0_13, %c0_14], %29 {strides = array<i32>} : memref<1x344x49xf32, #tpu.memory_space<vmem>>, vector<1x344x49xf32>,
    return
  }
}

</mosaic_0001>

<bundles_post_ra>
// kernel: tpu_custom_call.1
= control target key start
LH: loop header
LB: loop body
LE: loop exit
PB: predicated region body
PF: predicated region fallthrough
CT: control target
= control target key end

     0   :  { %vm54_vm0 = vcmask 400384   ;;  %s1704_s15 = smov 1   ;;  %s3645_s0 = inlined_call_operand.vmem [shape: f32[1,344,49], index: 0, kind: input, shape index: {}]   ;;  %s3646_s1 = inlined_call_operand.vmem [shape: f32[344,2], index: 1, kind: input, shape index: {}]   ;;  %s3647_s2 = inlined_call_operand.vmem [shape: f32[1,344,49], index: 2, kind: output, shape index: {}]  }
   0x1   :  { %v1724_v0 = vld [vmem:[%s3645_s0 + $0x10] sm:$0xff]  ;;  %v1729_v1 = vld [vmem:[%s3645_s0] sm:$0xff]  ;;  %v1734_v2 = vld [vmem:[%s3645_s0 + $0x18] sm:$0xff] }
   0x2   :  { %v61_v3 = vsel %vm54_vm0, %v1724_v0, 0.0  ;;  %v55_v4 = vsel %vm54_vm0, %v1729_v1, 0.0  ;;  %v1743_v5 = vld [vmem:[%s3645_s0 + $0x8] sm:$0xff]  ;;  %v64_v6 = vsel %vm54_vm0, %v1734_v2, 0.0  ;;  %v1757_v9 = vld [vmem:[%s3645_s0 + $0x20] sm:$0xff]  ;;  %v1766_v12 = vld [vmem:[%s3645_s0 + $0x38] sm:$0xff] }
   0x3   :  { %62 = vadd.xlane.f32.xlu1 %v61_v3  ;;  %56 = vadd.xlane.f32.xlu0 %v55_v4  ;;  %v58_v7 = vsel %vm54_vm0, %v1743_v5, 0.0  ;;  %v1752_v8 = vld [vmem:[%s3645_s0 + $0x28] sm:$0xff]  ;;  %v67_v11 = vsel %vm54_vm0, %v1757_v9, 0.0  ;;  %v1771_v13 = vld [vmem:[%s3645_s0 + $0x30] sm:$0xff]  ;;  %v76_v14 = vsel %vm54_vm0, %v1766_v12, 0.0  ;;  %v1785_v17 = vld [vmem:[%s3645_s0 + $0x40] sm:$0xff] }
   0x4   :  { %v70_v10 = vsel %vm54_vm0, %v1752_v8, 0.0  ;;  %v73_v15 = vsel %vm54_vm0, %v1771_v13, 0.0  ;;  %v1780_v16 = vld [vmem:[%s3645_s0 + $0x48] sm:$0xff]  ;;  %v79_v19 = vsel %vm54_vm0, %v1785_v17, 0.0  ;;  %v1794_v20 = vld [vmem:[%s3645_s0 + $0x58] sm:$0xff]  ;;  %v1799_v21 = vld [vmem:[%s3645_s0 + $0x50] sm:$0xff] }
   0x5   :  { %v82_v18 = vsel %vm54_vm0, %v1780_v16, 0.0  ;;  %v88_v22 = vsel %vm54_vm0, %v1794_v20, 0.0  ;;  %v85_v23 = vsel %vm54_vm0, %v1799_v21, 0.0  ;;  %v1808_v24 = vld [vmem:[%s3645_s0 + $0x68] sm:$0xff]  ;;  %v1813_v25 = vld [vmem:[%s3645_s0 + $0x60] sm:$0xff]  ;;  %v1822_v28 = vld [vmem:[%s3645_s0 + $0x78] sm:$0xff] }
   0x6   :  { %v94_v26 = vsel %vm54_vm0, %v1808_v24, 0.0  ;;  %v91_v27 = vsel %vm54_vm0, %v1813_v25, 0.0  ;;  %v1827_v29 = vld [vmem:[%s3645_s0 + $0x70] sm:$0xff]  ;;  %v100_v30 = vsel %vm54_vm0, %v1822_v28, 0.0  ;;  %v1836_v32 = vld [vmem:[%s3645_s0 + $0x88] sm:$0xff]  ;;  %v1841_v33 = vld [vmem:[%s3645_s0 + $0x80] sm:$0xff] }
   0x7   :  { %65 = vadd.xlane.f32.xlu1 %v64_v6  ;;  %59 = vadd.xlane.f32.xlu0 %v58_v7  ;;  %v97_v31 = vsel %vm54_vm0, %v1827_v29, 0.0  ;;  %v106_v34 = vsel %vm54_vm0, %v1836_v32, 0.0  ;;  %v103_v35 = vsel %vm54_vm0, %v1841_v33, 0.0  ;;  %v1850_v36 = vld [vmem:[%s3645_s0 + $0x98] sm:$0xff]  ;;  %v1855_v37 = vld [vmem:[%s3645_s0 + $0x90] sm:$0xff]  ;;  %v1864_v40 = vld [vmem:[%s3645_s0 + $0xa8] sm:$0xff] }
   0x8   :  { %v112_v38 = vsel %vm54_vm0, %v1850_v36, 0.0  ;;  %v109_v39 = vsel %vm54_vm0, %v1855_v37, 0.0  ;;  %v1869_v41 = vld [vmem:[%s3645_s0 + $0xa0] sm:$0xff]  ;;  %v118_v42 = vsel %vm54_vm0, %v1864_v40, 0.0  ;;  %v1878_v44 = vld [vmem:[%s3645_s0 + $0xb8] sm:$0xff]  ;;  %v1883_v45 = vld [vmem:[%s3645_s0 + $0xb0] sm:$0xff] }
   0x9   :  { %v115_v43 = vsel %vm54_vm0, %v1869_v41, 0.0  ;;  %v124_v46 = vsel %vm54_vm0, %v1878_v44, 0.0  ;;  %v121_v47 = vsel %vm54_vm0, %v1883_v45, 0.0  ;;  %v1892_v48 = vld [vmem:[%s3645_s0 + $0xc8] sm:$0xff]  ;;  %v1897_v49 = vld [vmem:[%s3645_s0 + $0xc0] sm:$0xff]  ;;  %v1906_v52 = vld [vmem:[%s3645_s0 + $0xd8] sm:$0xff] }
   0xa   :  { %v130_v50 = vsel %vm54_vm0, %v1892_v48, 0.0  ;;  %v127_v51 = vsel %vm54_vm0, %v1897_v49, 0.0  ;;  %v1911_v53 = vld [vmem:[%s3645_s0 + $0xd0] sm:$0xff]  ;;  %v136_v54 = vsel %vm54_vm0, %v1906_v52, 0.0  ;;  %v1920_v56 = vld [vmem:[%s3645_s0 + $0xe8] sm:$0xff]  ;;  %v1925_v57 = vld [vmem:[%s3645_s0 + $0xe0] sm:$0xff] }
   0xb   :  { %71 = vadd.xlane.f32.xlu1 %v70_v10  ;;  %68 = vadd.xlane.f32.xlu0 %v67_v11  ;;  %v133_v55 = vsel %vm54_vm0, %v1911_v53, 0.0  ;;  %v142_v58 = vsel %vm54_vm0, %v1920_v56, 0.0  ;;  %v139_v59 = vsel %vm54_vm0, %v1925_v57, 0.0  ;;  %v1934_v60 = vld [vmem:[%s3645_s0 + $0xf8] sm:$0xff]  ;;  %v1939_v61 = vld [vmem:[%s3645_s0 + $0xf0] sm:$0xff]  ;;  %v1948_v3 = vld [vmem:[%s3645_s0 + $0x108] sm:$0xff] }
   0xc   :  { %v148_v62 = vsel %vm54_vm0, %v1934_v60, 0.0  ;;  %v145_v63 = vsel %vm54_vm0, %v1939_v61, 0.0  ;;  %v1953_v4 = vld [vmem:[%s3645_s0 + $0x100] sm:$0xff]  ;;  %v154_v6 = vsel %vm54_vm0, %v1948_v3, 0.0  ;;  %v1962_v10 = vld [vmem:[%s3645_s0 + $0x118] sm:$0xff]  ;;  %v1967_v11 = vld [vmem:[%s3645_s0 + $0x110] sm:$0xff] }
   0xd   :  { %v151_v7 = vsel %vm54_vm0, %v1953_v4, 0.0 }
   0xf   :  { %77 = vadd.xlane.f32.xlu1 %v76_v14  ;;  %74 = vadd.xlane.f32.xlu0 %v73_v15  ;;  %v160_v14 = vsel %vm54_vm0, %v1962_v10, 0.0  ;;  %v157_v15 = vsel %vm54_vm0, %v1967_v11, 0.0 }
  0x13   :  { %83 = vadd.xlane.f32.xlu1 %v82_v18  ;;  %80 = vadd.xlane.f32.xlu0 %v79_v19  ;;  %v1976_v18 = vld [vmem:[%s3645_s0 + $0x128] sm:$0xff]  ;;  %v1981_v19 = vld [vmem:[%s3645_s0 + $0x120] sm:$0xff] }
  0x17   :  { %89 = vadd.xlane.f32.xlu1 %v88_v22  ;;  %86 = vadd.xlane.f32.xlu0 %v85_v23  ;;  %v166_v22 = vsel %vm54_vm0, %v1976_v18, 0.0  ;;  %v163_v23 = vsel %vm54_vm0, %v1981_v19, 0.0 }
  0x1b   :  { %95 = vadd.xlane.f32.xlu1 %v94_v26  ;;  %92 = vadd.xlane.f32.xlu0 %v91_v27  ;;  %v1990_v26 = vld [vmem:[%s3645_s0 + $0x138] sm:$0xff]  ;;  %v1995_v27 = vld [vmem:[%s3645_s0 + $0x130] sm:$0xff] }
  0x1f   :  { %101 = vadd.xlane.f32.xlu1 %v100_v30  ;;  %98 = vadd.xlane.f32.xlu0 %v97_v31  ;;  %v172_v30 = vsel %vm54_vm0, %v1990_v26, 0.0  ;;  %v169_v31 = vsel %vm54_vm0, %v1995_v27, 0.0 }
  0x23   :  { %107 = vadd.xlane.f32.xlu1 %v106_v34  ;;  %104 = vadd.xlane.f32.xlu0 %v103_v35  ;;  %v2004_v34 = vld [vmem:[%s3645_s0 + $0x148] sm:$0xff]  ;;  %v2009_v35 = vld [vmem:[%s3645_s0 + $0x140] sm:$0xff] }
  0x27   :  { %113 = vadd.xlane.f32.xlu1 %v112_v38  ;;  %110 = vadd.xlane.f32.xlu0 %v109_v39  ;;  %v178_v38 = vsel %vm54_vm0, %v2004_v34, 0.0  ;;  %v175_v39 = vsel %vm54_vm0, %v2009_v35, 0.0 }
  0x2b   :  { %119 = vadd.xlane.f32.xlu1 %v118_v42  ;;  %116 = vadd.xlane.f32.xlu0 %v115_v43  ;;  %v184_v42 = vmul.f32 %v1729_v1, %v1729_v1  ;;  %v2020_v43 = vld [vmem:[%s3645_s0 + $0x150] sm:$0xff] }
  0x2f   :  { %125 = vadd.xlane.f32.xlu1 %v124_v46  ;;  %122 = vadd.xlane.f32.xlu0 %v121_v47  ;;  %v227_v46 = vsel %vm54_vm0, %v184_v42, 0.0  ;;  %v181_v47 = vsel %vm54_vm0, %v2020_v43, 0.0  ;;  %v201_v42 = vmul.f32 %v1836_v32, %v1836_v32  ;;  %v206_v32 = vmul.f32 %v1883_v45, %v1883_v45 }
  0x33   :  { %131 = vadd.xlane.f32.xlu1 %v130_v50  ;;  %128 = vadd.xlane.f32.xlu0 %v127_v51  ;;  %v186_v50 = vmul.f32 %v1724_v0, %v1724_v0  ;;  %v185_v51 = vmul.f32 %v1743_v5, %v1743_v5  ;;  %v190_v5 = vmul.f32 %v1771_v13, %v1771_v13 }
  0x35   :  { %v233_v1 = vsel %vm54_vm0, %v186_v50, 0.0 }
  0x37   :  { %137 = vadd.xlane.f32.xlu1 %v136_v54  ;;  %134 = vadd.xlane.f32.xlu0 %v133_v55  ;;  %v230_v54 = vsel %vm54_vm0, %v185_v51, 0.0  ;;  %v188_v55 = vmul.f32 %v1757_v9, %v1757_v9  ;;  %v205_v51 = vmul.f32 %v1864_v40, %v1864_v40  ;;  %v210_v40 = vmul.f32 %v1911_v53, %v1911_v53 }
  0x3b   :  { %143 = vadd.xlane.f32.xlu1 %v142_v58  ;;  %140 = vadd.xlane.f32.xlu0 %v139_v59  ;;  %v187_v58 = vmul.f32 %v1734_v2, %v1734_v2  ;;  %v239_v59 = vsel %vm54_vm0, %v188_v55, 0.0  ;;  %v192_v2 = vmul.f32 %v1785_v17, %v1785_v17 }
  0x3d   :  { %v236_v0 = vsel %vm54_vm0, %v187_v58, 0.0  ;;  %v209_v58 = vmul.f32 %v1892_v48, %v1892_v48  ;;  %v214_v48 = vmul.f32 %v1939_v61, %v1939_v61 }
  0x3f   :  { %149 = vadd.xlane.f32.xlu1 %v148_v62  ;;  %146 = vadd.xlane.f32.xlu0 %v145_v63  ;;  %v189_v62 = vmul.f32 %v1752_v8, %v1752_v8  ;;  %v245_v63 = vsel %vm54_vm0, %v190_v5, 0.0  ;;  %v194_v8 = vmul.f32 %v1799_v21, %v1799_v21 }
  0x41   :  { %v242_v9 = vsel %vm54_vm0, %v189_v62, 0.0  ;;  %v213_v62 = vmul.f32 %v1920_v56, %v1920_v56 }
  0x43   :  { %155 = vadd.xlane.f32.xlu1 %v154_v6  ;;  %152 = vadd.xlane.f32.xlu0 %v151_v7  ;;  %v191_v6 = vmul.f32 %v1766_v12, %v1766_v12  ;;  %v251_v7 = vsel %vm54_vm0, %v192_v2, 0.0  ;;  %v196_v12 = vmul.f32 %v1813_v25, %v1813_v25  ;;  %v216_v2 = vmul.f32 %v1953_v4, %v1953_v4 }
  0x45   :  { %v248_v13 = vsel %vm54_vm0, %v191_v6, 0.0  ;;  %v215_v6 = vmul.f32 %v1934_v60, %v1934_v60 }
  0x47   :  { %161 = vadd.xlane.f32.xlu1 %v160_v14  ;;  %158 = vadd.xlane.f32.xlu0 %v157_v15  ;;  %v193_v14 = vmul.f32 %v1780_v16, %v1780_v16  ;;  %v257_v15 = vsel %vm54_vm0, %v194_v8, 0.0  ;;  %v198_v16 = vmul.f32 %v1827_v29, %v1827_v29  ;;  %v218_v8 = vmul.f32 %v1967_v11, %v1967_v11 }
  0x49   :  { %v254_v17 = vsel %vm54_vm0, %v193_v14, 0.0  ;;  %v217_v14 = vmul.f32 %v1948_v3, %v1948_v3 }
  0x4b   :  { %167 = vadd.xlane.f32.xlu1 %v166_v22  ;;  %164 = vadd.xlane.f32.xlu0 %v163_v23  ;;  %v195_v22 = vmul.f32 %v1794_v20, %v1794_v20  ;;  %v263_v23 = vsel %vm54_vm0, %v196_v12, 0.0  ;;  %v200_v20 = vmul.f32 %v1841_v33, %v1841_v33  ;;  %v278_v33 = vsel %vm54_vm0, %v201_v42, 0.0 }
  0x4c   :  { %v220_v12 = vmul.f32 %v1981_v19, %v1981_v19  ;;  %v225_v42 = vmul.f32 %v2004_v34, %v2004_v34 }
  0x4d   :  { %v260_v21 = vsel %vm54_vm0, %v195_v22, 0.0  ;;  %v219_v22 = vmul.f32 %v1962_v10, %v1962_v10 }
  0x4f   :  { %173 = vadd.xlane.f32.xlu1 %v172_v30  ;;  %170 = vadd.xlane.f32.xlu0 %v169_v31  ;;  %v197_v30 = vmul.f32 %v1808_v24, %v1808_v24  ;;  %v269_v31 = vsel %vm54_vm0, %v198_v16, 0.0  ;;  %v202_v24 = vmul.f32 %v1855_v37, %v1855_v37  ;;  %v222_v16 = vmul.f32 %v1995_v27, %v1995_v27 }
  0x51   :  { %v266_v25 = vsel %vm54_vm0, %v197_v30, 0.0  ;;  %v221_v30 = vmul.f32 %v1976_v18, %v1976_v18 }
  0x53   :  { %179 = vadd.xlane.f32.xlu1 %v178_v38  ;;  %176 = vadd.xlane.f32.xlu0 %v175_v39  ;;  %v199_v38 = vmul.f32 %v1822_v28, %v1822_v28  ;;  %v275_v39 = vsel %vm54_vm0, %v200_v20, 0.0  ;;  %v204_v28 = vmul.f32 %v1869_v41, %v1869_v41  ;;  %v290_v41 = vsel %vm54_vm0, %v205_v51, 0.0 }
  0x54   :  { %v224_v20 = vmul.f32 %v2009_v35, %v2009_v35 }
  0x55   :  { %v272_v29 = vsel %vm54_vm0, %v199_v38, 0.0  ;;  %v287_v50 = vsel %vm54_vm0, %v204_v28, 0.0  ;;  %v223_v38 = vmul.f32 %v1990_v26, %v1990_v26 }
  0x56   :  { %v347_v18 = vsel %vm54_vm0, %v224_v20, 0.0 }
  0x57   :  { %228 = vadd.xlane.f32.xlu1 %v227_v46  ;;  %182 = vadd.xlane.f32.xlu0 %v181_v47  ;;  %v281_v46 = vsel %vm54_vm0, %v202_v24, 0.0  ;;  %v203_v47 = vmul.f32 %v1850_v36, %v1850_v36  ;;  %v208_v36 = vmul.f32 %v1897_v49, %v1897_v49  ;;  %v302_v49 = vsel %vm54_vm0, %v209_v58, 0.0 }
  0x58   :  { %v226_v24 = vmul.f32 %v2020_v43, %v2020_v43 }
  0x59   :  { %v284_v37 = vsel %vm54_vm0, %v203_v47, 0.0  ;;  %v299_v55 = vsel %vm54_vm0, %v208_v36, 0.0 }
  0x5a   :  { %v353_v26 = vsel %vm54_vm0, %v226_v24, 0.0 }
  0x5b   :  { %234 = vadd.xlane.f32.xlu1 %v233_v1  ;;  %231 = vadd.xlane.f32.xlu0 %v230_v54  ;;  %v293_v1 = vsel %vm54_vm0, %v206_v32, 0.0  ;;  %v207_v54 = vmul.f32 %v1878_v44, %v1878_v44  ;;  %v212_v44 = vmul.f32 %v1925_v57, %v1925_v57 }
  0x5d   :  { %v296_v45 = vsel %vm54_vm0, %v207_v54, 0.0  ;;  %v311_v5 = vsel %vm54_vm0, %v212_v44, 0.0 }
  0x5f   :  { %240 = vadd.xlane.f32.xlu1 %v239_v59  ;;  %237 = vadd.xlane.f32.xlu0 %v236_v0  ;;  %v305_v59 = vsel %vm54_vm0, %v210_v40, 0.0  ;;  %v211_v0 = vmul.f32 %v1906_v52, %v1906_v52  ;;  %v317_v52 = vsel %vm54_vm0, %v214_v48, 0.0 }
  0x61   :  { %v308_v53 = vsel %vm54_vm0, %v211_v0, 0.0 }
  0x63   :  { %246 = vadd.xlane.f32.xlu1 %v245_v63  ;;  %243 = vadd.xlane.f32.xlu0 %v242_v9  ;;  %v314_v9 = vsel %vm54_vm0, %v213_v62, 0.0 }
  0x67   :  { %252 = vadd.xlane.f32.xlu1 %v251_v7  ;;  %249 = vadd.xlane.f32.xlu0 %v248_v13  ;;  %v323_v7 = vsel %vm54_vm0, %v216_v2, 0.0  ;;  %v320_v13 = vsel %vm54_vm0, %v215_v6, 0.0 }
  0x6b   :  { %258 = vadd.xlane.f32.xlu1 %v257_v15  ;;  %255 = vadd.xlane.f32.xlu0 %v254_v17  ;;  %v329_v15 = vsel %vm54_vm0, %v218_v8, 0.0  ;;  %v326_v17 = vsel %vm54_vm0, %v217_v14, 0.0 }
  0x6f   :  { %264 = vadd.xlane.f32.xlu1 %v263_v23  ;;  %261 = vadd.xlane.f32.xlu0 %v260_v21  ;;  %v335_v23 = vsel %vm54_vm0, %v220_v12, 0.0  ;;  %v332_v21 = vsel %vm54_vm0, %v219_v22, 0.0 }
  0x73   :  { %270 = vadd.xlane.f32.xlu1 %v269_v31  ;;  %267 = vadd.xlane.f32.xlu0 %v266_v25  ;;  %v341_v31 = vsel %vm54_vm0, %v222_v16, 0.0  ;;  %v338_v25 = vsel %vm54_vm0, %v221_v30, 0.0 }
  0x77   :  { %276 = vadd.xlane.f32.xlu1 %v275_v39  ;;  %273 = vadd.xlane.f32.xlu0 %v272_v29  ;;  %v344_v29 = vsel %vm54_vm0, %v223_v38, 0.0 }
  0x7b   :  { %282 = vadd.xlane.f32.xlu1 %v281_v46  ;;  %279 = vadd.xlane.f32.xlu0 %v278_v33  ;;  %v350_v33 = vsel %vm54_vm0, %v225_v42, 0.0 }
  0x7f   :  { %288 = vadd.xlane.f32.xlu1 %v287_v50  ;;  %285 = vadd.xlane.f32.xlu0 %v284_v37 }
  0x83   :  { %294 = vadd.xlane.f32.xlu1 %v293_v1  ;;  %291 = vadd.xlane.f32.xlu0 %v290_v41 }
  0x87   :  { %300 = vadd.xlane.f32.xlu1 %v299_v55  ;;  %297 = vadd.xlane.f32.xlu0 %v296_v45 }
  0x8b   :  { %306 = vadd.xlane.f32.xlu1 %v305_v59  ;;  %303 = vadd.xlane.f32.xlu0 %v302_v49 }
  0x8f   :  { %312 = vadd.xlane.f32.xlu1 %v311_v5  ;;  %309 = vadd.xlane.f32.xlu0 %v308_v53  ;;  %v1703_v5 = vmov 0  }
  0x90   :  { %v2113_v63 = vpop.xlane.xlu1 %62  ;;  %v2115_v57 = vpop.xlane.xlu0 %56  ;;  %1568 = vset.pattern.permute.xlu0 %v1703_v5  ;;  %1567 = vset.pattern.permute.xlu1 %v1703_v5 }
  0x91   :  { %v2229_v8 = vmul.f32 0.020408163, %v2115_v57 }
  0x93   :  { %318 = vadd.xlane.f32.xlu1 %v317_v52  ;;  %315 = vadd.xlane.f32.xlu0 %v314_v9 }
  0x94   :  { %v2123_v61 = vpop.xlane.xlu1 %65  ;;  %v2125_v56 = vpop.xlane.xlu0 %59 }
  0x95   :  { %v2232_v14 = vmul.f32 0.020408163, %v2123_v61 }
  0x97   :  { %324 = vadd.xlane.f32.xlu1 %v323_v7  ;;  %321 = vadd.xlane.f32.xlu0 %v320_v13  ;;  %v2226_v13 = vmul.f32 0.020408163, %v2113_v63 }
  0x98   :  { %v2133_v4 = vpop.xlane.xlu1 %71  ;;  %v2135_v60 = vpop.xlane.xlu0 %68 }
  0x99   :  { %v2241_v12 = vmul.f32 0.020408163, %v2135_v60 }
  0x9b   :  { %330 = vadd.xlane.f32.xlu1 %v329_v15  ;;  %327 = vadd.xlane.f32.xlu0 %v326_v17  ;;  %v2235_v15 = vmul.f32 0.020408163, %v2125_v56  ;;  %v2238_v17 = vmul.f32 0.020408163, %v2133_v4  ;;  %v444_v56 = vmul.f32 %v2226_v13, %v2226_v13  ;;  %v442_v4 = vmul.f32 %v2229_v8, %v2229_v8 }
  0x9c   :  { %v2143_v11 = vpop.xlane.xlu1 %77  ;;  %v2145_v3 = vpop.xlane.xlu0 %74 }
  0x9d   :  { %v2244_v22 = vmul.f32 0.020408163, %v2143_v11  ;;  %v2247_v63 = vmul.f32 0.020408163, %v2145_v3  ;;  %v445_v11 = vmul.f32 %v2232_v14, %v2232_v14  ;;  %v443_v3 = vmul.f32 %v2235_v15, %v2235_v15 }
  0x9f   :  { %336 = vadd.xlane.f32.xlu1 %v335_v23  ;;  %333 = vadd.xlane.f32.xlu0 %v332_v21  ;;  %v448_v20 = vmul.f32 %v2247_v63, %v2247_v63 }
  0xa0   :  { %v84_v19 = vpop.xlane.xlu1 %83  ;;  %v2153_v10 = vpop.xlane.xlu0 %80 }
  0xa1   :  { %v2249_v57 = vmul.f32 0.020408163, %v84_v19  ;;  %v2258_v60 = vmul.f32 0.020408163, %v2153_v10  ;;  %v2270_v19 = vmul.f32 %v2238_v17, %v2238_v17  ;;  %v2276_v10 = vmul.f32 %v2244_v22, %v2244_v22 }
  0xa3   :  { %342 = vadd.xlane.f32.xlu1 %v341_v31  ;;  %339 = vadd.xlane.f32.xlu0 %v338_v25  ;;  %v446_v31 = vmul.f32 %v2241_v12, %v2241_v12  ;;  %v2282_v38 = vmul.f32 %v2249_v57, %v2249_v57  ;;  %v2290_v24 = vmul.f32 %v2258_v60, %v2258_v60 }
  0xa4   :  { %v90_v27 = vpop.xlane.xlu1 %89  ;;  %v87_v39 = vpop.xlane.xlu0 %86 }
  0xa5   :  { %v2264_v16 = vmul.f32 0.020408163, %v90_v27  ;;  %v2266_v30 = vmul.f32 0.020408163, %v87_v39 }
  0xa7   :  { %348 = vadd.xlane.f32.xlu1 %v347_v18  ;;  %345 = vadd.xlane.f32.xlu0 %v344_v29  ;;  %v2294_v5 = vmul.f32 %v2264_v16, %v2264_v16 }
  0xa8   :  { %v96_v35 = vpop.xlane.xlu1 %95  ;;  %v93_v46 = vpop.xlane.xlu0 %92 }
  0xa9   :  { %v2284_v27 = vmul.f32 0.020408163, %v96_v35  ;;  %v2286_v39 = vmul.f32 0.020408163, %v93_v46 }
  0xab   :  { %354 = vadd.xlane.f32.xlu1 %v353_v26  ;;  %351 = vadd.xlane.f32.xlu0 %v350_v33 }
  0xac   :  { %v2169_v28 = vpop.xlane.xlu1 %101  ;;  %v2171_v47 = vpop.xlane.xlu0 %98 }
  0xad   :  { %v2301_v35 = vmul.f32 0.020408163, %v2169_v28  ;;  %v2304_v46 = vmul.f32 0.020408163, %v2171_v47 }
  0xaf   :  { %3696 = vst [vmem:[#allocation8_spill] sm:$0xff] %v2301_v35 }
  0xb0   :  { %v2173_v50 = vpop.xlane.xlu1 %107  ;;  %v2175_v43 = vpop.xlane.xlu0 %104 }
  0xb1   :  { %v2318_v28 = vmul.f32 0.020408163, %v2175_v43 }
  0xb4   :  { %v2177_v37 = vpop.xlane.xlu1 %113  ;;  %v2179_v34 = vpop.xlane.xlu0 %110 }
  0xb5   :  { %v2321_v47 = vmul.f32 0.020408163, %v2177_v37  ;;  %v2332_v43 = vmul.f32 0.020408163, %v2179_v34 }
  0xb7   :  { %3698 = vst [vmem:[#allocation10_spill] sm:$0xff] %v2321_v47  ;;  %3699 = vst [vmem:[#allocation11_spill] sm:$0xff] %v2332_v43 }
  0xb8   :  { %v2181_v32 = vpop.xlane.xlu1 %119  ;;  %v2183_v51 = vpop.xlane.xlu0 %116 }
  0xbc   :  { %v2185_v1 = vpop.xlane.xlu1 %125  ;;  %v2187_v41 = vpop.xlane.xlu0 %122 }
  0xc0   :  { %v2189_v36 = vpop.xlane.xlu1 %131  ;;  %v2191_v54 = vpop.xlane.xlu0 %128 }
  0xc4   :  { %v2193_v55 = vpop.xlane.xlu1 %137  ;;  %v2195_v45 = vpop.xlane.xlu0 %134 }
  0xc8   :  { %v2197_v40 = vpop.xlane.xlu1 %143  ;;  %v2199_v58 = vpop.xlane.xlu0 %140 }
  0xcc   :  { %v2201_v59 = vpop.xlane.xlu1 %149  ;;  %v2203_v49 = vpop.xlane.xlu0 %146 }
  0xd0   :  { %v2205_v44 = vpop.xlane.xlu1 %155  ;;  %v2207_v0 = vpop.xlane.xlu0 %152 }
  0xd4   :  { %v2209_v53 = vpop.xlane.xlu1 %161  ;;  %v2211_v48 = vpop.xlane.xlu0 %158 }
  0xd8   :  { %v2213_v62 = vpop.xlane.xlu1 %167  ;;  %v2215_v52 = vpop.xlane.xlu0 %164 }
  0xd9   :  { %3690 = vst [vmem:[#allocation2_spill] sm:$0xff] %v2215_v52 }
  0xdc   :  { %v2217_v9 = vpop.xlane.xlu1 %173  ;;  %v2219_v2 = vpop.xlane.xlu0 %170 }
  0xdd   :  { %3691 = vst [vmem:[#allocation3_spill] sm:$0xff] %v2217_v9  ;;  %3692 = vst [vmem:[#allocation4_spill] sm:$0xff] %v2219_v2  ;;  %v2343_v2 = vmul.f32 0.020408163, %v2181_v32  ;;  %v2346_v9 = vmul.f32 0.020408163, %v2183_v51 }
  0xde   :  { %v2357_v32 = vmul.f32 0.020408163, %v2185_v1 }
  0xdf   :  { %3700 = vst [vmem:[#allocation12_spill] sm:$0xff] %v2343_v2  ;;  %3701 = vst [vmem:[#allocation13_spill] sm:$0xff] %v2346_v9 }
  0xe0   :  { %v2221_v6 = vpop.xlane.xlu1 %179  ;;  %v2223_v7 = vpop.xlane.xlu0 %176  ;;  %3702 = vst [vmem:[#allocation14_spill] sm:$0xff] %v2357_v32 }
  0xe1   :  { %3693 = vst [vmem:[#allocation5_spill] sm:$0xff] %v2221_v6  ;;  %3694 = vst [vmem:[#allocation6_spill] sm:$0xff] %v2223_v7 }
  0xe4   :  { %v229_v23 = vpop.xlane.xlu1 %228  ;;  %v2251_v61 = vpop.xlane.xlu0 %182 }
  0xe5   :  { %3695 = vst [vmem:[#allocation7_spill] sm:$0xff] %v2251_v61  ;;  %v399_v21 = vmul.f32 0.020408163, %v229_v23  ;;  %v2298_v23 = vmul.f32 %v2266_v30, %v2266_v30  ;;  %v2315_v61 = vmul.f32 %v2286_v39, %v2286_v39 }
  0xe7   :  { %v485_v25 = vsub.f32 %v399_v21, %v442_v4  ;;  %v2307_v4 = vmul.f32 0.020408163, %v2173_v50 }
  0xe8   :  { %v235_v18 = vpop.xlane.xlu1 %234  ;;  %v232_v29 = vpop.xlane.xlu0 %231 }
  0xe9   :  { %v528_v42 = vmax.f32 %v485_v25, 0.0  ;;  %v401_v26 = vmul.f32 0.020408163, %v235_v18  ;;  %v400_v33 = vmul.f32 0.020408163, %v232_v29  ;;  %3697 = vst [vmem:[#allocation9_spill] sm:$0xff] %v2307_v4  ;;  %v2311_v29 = vmul.f32 %v2284_v27, %v2284_v27 }
  0xea   :  { %v2336_v37 = vmul.f32 %v2307_v4, %v2307_v4  ;;  %v2350_v4 = vmul.f32 %v2321_v47, %v2321_v47  ;;  %v2362_v47 = vmul.f32 %v2343_v2, %v2343_v2  ;;  %v2389_v2 = vmul.f32 0.020408163, %v2195_v45 }
  0xeb   :  { %v571_v21 = vadd.f32 0.001, %v528_v42  ;;  %v487_v25 = vsub.f32 %v401_v26, %v444_v56  ;;  %v486_v18 = vsub.f32 %v400_v33, %v443_v3  ;;  %v2325_v26 = vmul.f32 %v2301_v35, %v2301_v35 }
  0xec   :  { %v241_v7 = vpop.xlane.xlu1 %240  ;;  %v238_v50 = vpop.xlane.xlu0 %237  ;;  %v2329_v33 = vmul.f32 %v2304_v46, %v2304_v46  ;;  %3706 = vst [vmem:[#allocation18_spill] sm:$0xff] %v2389_v2 }
  0xed   :  { %1571 = vrsqrt.f32 %v571_v21  ;;  %v530_v42 = vmax.f32 %v487_v25, 0.0  ;;  %v529_v56 = vmax.f32 %v486_v18, 0.0  ;;  %v403_v3 = vmul.f32 0.020408163, %v241_v7 }
  0xee   :  { %v402_v6 = vmul.f32 0.020408163, %v238_v50  ;;  %v2340_v7 = vmul.f32 %v2318_v28, %v2318_v28 }
  0xef   :  { %v573_v21 = vadd.f32 0.001, %v530_v42  ;;  %v572_v25 = vadd.f32 0.001, %v529_v56  ;;  %v489_v18 = vsub.f32 %v403_v3, %v446_v31  ;;  %v2354_v3 = vmul.f32 %v2332_v43, %v2332_v43 }
  0xf0   :  { %v488_v34 = vsub.f32 %v402_v6, %v445_v11  ;;  %v247_v35 = vpop.xlane.xlu1 %246  ;;  %v244_v50 = vpop.xlane.xlu0 %243 }
  0xf1   :  { %v532_v42 = vmax.f32 %v489_v18, 0.0  ;;  %v405_v56 = vmul.f32 0.020408163, %v247_v35  ;;  %v404_v31 = vmul.f32 0.020408163, %v244_v50  ;;  %1573 = vrsqrt.f32 %v572_v25 }
  0xf2   :  { %v531_v51 = vmax.f32 %v488_v34, 0.0  ;;  %1575 = vrsqrt.f32 %v573_v21  ;;  %v2366_v35 = vmul.f32 %v2346_v9, %v2346_v9  ;;  %v2369_v18 = vmul.f32 0.020408163, %v2187_v41 }
  0xf3   :  { %v575_v6 = vadd.f32 0.001, %v532_v42  ;;  %v491_v11 = vsub.f32 %v405_v56, %v448_v20  ;;  %v490_v52 = vsub.f32 %v404_v31, %v2270_v19  ;;  %v657_v19 = vld [vmem:[%s3646_s1] sm:$0xff]  ;;  %v2376_v42 = vmul.f32 %v2357_v32, %v2357_v32 }
  0xf4   :  { %v574_v1 = vadd.f32 0.001, %v531_v51  ;;  %v253_v50 = vpop.xlane.xlu1 %252  ;;  %v250_v25 = vpop.xlane.xlu0 %249  ;;  %v2379_v56 = vmul.f32 0.020408163, %v2189_v36  ;;  %v2382_v41 = vmul.f32 0.020408163, %v2191_v54 }
  0xf5   :  { %1577 = vrsqrt.f32 %v575_v6  ;;  %v534_v21 = vmax.f32 %v491_v11, 0.0  ;;  %v533_v34 = vmax.f32 %v490_v52, 0.0  ;;  %v407_v20 = vmul.f32 0.020408163, %v253_v50 }
  0xf6   :  { %3703 = vst [vmem:[#allocation15_spill] sm:$0xff] %v2379_v56  ;;  %3704 = vst [vmem:[#allocation16_spill] sm:$0xff] %v2382_v41  ;;  %v406_v31 = vmul.f32 0.020408163, %v250_v25  ;;  %1579 = vrsqrt.f32 %v574_v1  ;;  %v2386_v50 = vmul.f32 0.020408163, %v2193_v55  ;;  %v2400_v55 = vmul.f32 %v2379_v56, %v2379_v56 }
  0xf7   :  { %v1572_v51 = vpop.eup %1571  ;;  %v577_v6 = vadd.f32 0.001, %v534_v21  ;;  %v576_v52 = vadd.f32 0.001, %v533_v34  ;;  %v493_v11 = vsub.f32 %v407_v20, %v2290_v24  ;;  %v2396_v21 = vmul.f32 %v2369_v18, %v2369_v18 }
  0xf8   :  { %3705 = vst [vmem:[#allocation17_spill] sm:$0xff] %v2386_v50  ;;  %v492_v32 = vsub.f32 %v406_v31, %v2276_v10  ;;  %v259_v36 = vpop.xlane.xlu1 %258  ;;  %v256_v9 = vpop.xlane.xlu0 %255  ;;  %v2392_v43 = vmul.f32 %v1572_v51, %v657_v19  ;;  %v2411_v31 = vmul.f32 %v2382_v41, %v2382_v41 }
  0xf9   :  { %1581 = vrsqrt.f32 %v577_v6  ;;  %v536_v54 = vmax.f32 %v493_v11, 0.0  ;;  %v409_v25 = vmul.f32 0.020408163, %v259_v36  ;;  %v408_v1 = vmul.f32 0.020408163, %v256_v9  ;;  %v658_v9 = vld [vmem:[%s3646_s1 + $0x8] sm:$0xff] }
  0xfa   :  { %3707 = vst [vmem:[#allocation19_spill] sm:$0xff] %v2392_v43  ;;  %v535_v45 = vmax.f32 %v492_v32, 0.0  ;;  %v743_v10 = vmul.f32 %v2392_v43, %v2229_v8  ;;  %1583 = vrsqrt.f32 %v576_v52  ;;  %v2415_v32 = vmul.f32 %v2386_v50, %v2386_v50 }
  0xfb   :  { %v579_v24 = vadd.f32 0.001, %v536_v54  ;;  %v495_v34 = vsub.f32 %v409_v25, %v2298_v23  ;;  %v494_v20 = vsub.f32 %v408_v1, %v2282_v38  ;;  %v1574_v19 = vpop.eup %1573  ;;  %v2419_v8 = vmul.f32 %v2389_v2, %v2389_v2  ;;  %v2425_v54 = vld [vmem:[%s3646_s1 + $0x20] sm:$0xff]  ;;  %v659_v25 = vld [vmem:[%s3646_s1 + $0x10] sm:$0xff] }
  0xfc   :  { %v578_v23 = vadd.f32 0.001, %v535_v45  ;;  %v265_v51 = vpop.xlane.xlu1 %264  ;;  %829 = vrot.lane.b32.xlu0 %v743_v10, %s1704_s15  ;;  %v262_v38 = vpop.xlane.xlu0 %261  ;;  %3708 = vst [vmem:[#allocation20_spill] sm:$0xff] %v2425_v54  ;;  %v2431_v1 = vmul.f32 0.020408163, %v2197_v40 }
  0xfd   :  { %v1576_v6 = vpop.eup %1575  ;;  %1585 = vrsqrt.f32 %v579_v24  ;;  %v538_v52 = vmax.f32 %v495_v34, 0.0  ;;  %v537_v11 = vmax.f32 %v494_v20, 0.0  ;;  %v411_v36 = vmul.f32 0.020408163, %v265_v51 }
  0xfe   :  { %v2434_v45 = vmul.f32 0.020408163, %v2199_v58  ;;  %v410_v10 = vmul.f32 0.020408163, %v262_v38  ;;  %v2436_v24 = vmul.f32 %v1574_v19, %v658_v9  ;;  %1587 = vrsqrt.f32 %v578_v23  ;;  %v2450_v9 = vld [vmem:[%s3646_s1 + $0x18] sm:$0xff] }
  0xff   :  { %v1578_v34 = vpop.eup %1577  ;;  %v581_v20 = vadd.f32 0.001, %v538_v52  ;;  %v580_v51 = vadd.f32 0.001, %v537_v11  ;;  %v497_v43 = vsub.f32 %v411_v36, %v2315_v61  ;;  %v2445_v58 = vmul.f32 %v1576_v6, %v659_v25  ;;  %3709 = vst [vmem:[#allocation21_spill] sm:$0xff] %v2450_v9 }
 0x100   :  { %v496_v50 = vsub.f32 %v410_v10, %v2294_v5  ;;  %v271_v56 = vpop.xlane.xlu1 %270  ;;  %v744_v2 = vmul.f32 %v2436_v24, %v2235_v15  ;;  %v268_v40 = vpop.xlane.xlu0 %267  ;;  %v2443_v41 = vmul.f32 %v1578_v34, %v2425_v54  ;;  %v2455_v15 = vld [vmem:[%s3646_s1 + $0x30] sm:$0xff]  ;;  %v2459_v38 = vmul.f32 %v2431_v1, %v2431_v1 }
 0x101   :  { %v1580_v19 = vpop.eup %1579  ;;  %1589 = vrsqrt.f32 %v581_v20  ;;  %v540_v61 = vmax.f32 %v497_v43, 0.0  ;;  %v413_v23 = vmul.f32 0.020408163, %v271_v56  ;;  %v412_v5 = vmul.f32 0.020408163, %v268_v40  ;;  %3710 = vst [vmem:[#allocation22_spill] sm:$0xff] %v2455_v15 }
 0x102   :  { %v2463_v6 = vmul.f32 %v2434_v45, %v2434_v45  ;;  %v539_v52 = vmax.f32 %v496_v50, 0.0  ;;  %831 = vrot.lane.b32.xlu1 %v744_v2, %s1704_s15  ;;  %v747_v43 = vmul.f32 %v2443_v41, %v2241_v12  ;;  %1591 = vrsqrt.f32 %v580_v51 }
 0x103   :  { %v1582_v56 = vpop.eup %1581  ;;  %v583_v11 = vadd.f32 0.001, %v540_v61  ;;  %v499_v36 = vsub.f32 %v413_v23, %v2329_v33  ;;  %v498_v25 = vsub.f32 %v412_v5, %v2311_v29  ;;  %v745_v20 = vmul.f32 %v2445_v58, %v2226_v13  ;;  %v2482_v29 = vld [vmem:[%s3646_s1 + $0x40] sm:$0xff]  ;;  %v2487_v13 = vld [vmem:[%s3646_s1 + $0x28] sm:$0xff] }
 0x104   :  { %v582_v10 = vadd.f32 0.001, %v539_v52  ;;  %v277_v34 = vpop.xlane.xlu1 %276  ;;  %837 = vrot.lane.b32.xlu0 %v747_v43, %s1704_s15  ;;  %v274_v50 = vpop.xlane.xlu0 %273  ;;  %v2474_v2 = vmul.f32 %v1582_v56, %v2455_v15  ;;  %v2477_v12 = vmul.f32 %v1580_v19, %v2450_v9  ;;  %3711 = vst [vmem:[#allocation23_spill] sm:$0xff] %v2482_v29  ;;  %3712 = vst [vmem:[#allocation24_spill] sm:$0xff] %v2487_v13  ;;  %v2490_v23 = vmul.f32 0.020408163, %v2201_v59 }
 0x105   :  { %v1584_v51 = vpop.eup %1583  ;;  %1593 = vrsqrt.f32 %v583_v11  ;;  %v542_v40 = vmax.f32 %v499_v36, 0.0  ;;  %v541_v33 = vmax.f32 %v498_v25, 0.0  ;;  %v415_v61 = vmul.f32 0.020408163, %v277_v34 }
 0x106   :  { %v2493_v19 = vmul.f32 0.020408163, %v2203_v49  ;;  %833 = vrot.lane.b32.xlu1 %v745_v20, %s1704_s15  ;;  %v414_v5 = vmul.f32 0.020408163, %v274_v50  ;;  %v749_v52 = vmul.f32 %v2474_v2, %v2247_v63  ;;  %1595 = vrsqrt.f32 %v582_v10  ;;  %v2512_v10 = vld [vmem:[%s3646_s1 + $0x38] sm:$0xff] }
 0x107   :  { %v1586_v43 = vpop.eup %1585  ;;  %v585_v56 = vadd.f32 0.001, %v542_v40  ;;  %v584_v11 = vadd.f32 0.001, %v541_v33  ;;  %v501_v36 = vsub.f32 %v415_v61, %v2340_v7  ;;  %v746_v59 = vmul.f32 %v2477_v12, %v2232_v14  ;;  %3713 = vst [vmem:[#allocation25_spill] sm:$0xff] %v2512_v10  ;;  %v2517_v14 = vld [vmem:[%s3646_s1 + $0x50] sm:$0xff] }
 0x108   :  { %v500_v25 = vsub.f32 %v414_v5, %v2325_v26  ;;  %v283_v34 = vpop.xlane.xlu1 %282  ;;  %841 = vrot.lane.b32.xlu0 %v749_v52, %s1704_s15  ;;  %v280_v49 = vpop.xlane.xlu0 %279  ;;  %v2504_v20 = vmul.f32 %v1586_v43, %v2482_v29  ;;  %v2507_v63 = vmul.f32 %v1584_v51, %v2487_v13  ;;  %3714 = vst [vmem:[#allocation26_spill] sm:$0xff] %v2517_v14 }
 0x109   :  { %v1588_v7 = vpop.eup %1587  ;;  %1597 = vrsqrt.f32 %v585_v56  ;;  %v544_v26 = vmax.f32 %v501_v36, 0.0  ;;  %v417_v50 = vmul.f32 0.020408163, %v283_v34  ;;  %v416_v40 = vmul.f32 0.020408163, %v280_v49 }
 0x10a   :  { %v2521_v33 = vmul.f32 %v2490_v23, %v2490_v23  ;;  %v2525_v51 = vmul.f32 %v2493_v19, %v2493_v19  ;;  %v543_v61 = vmax.f32 %v500_v25, 0.0  ;;  %835 = vrot.lane.b32.xlu1 %v746_v59, %s1704_s15  ;;  %v751_v5 = vmul.f32 %v2504_v20, %v2258_v60 }
 0x10b   :  { %v1590_v52 = vpop.eup %1589  ;;  %1599 = vrsqrt.f32 %v584_v11  ;;  %v587_v43 = vadd.f32 0.001, %v544_v26  ;;  %v503_v56 = vsub.f32 %v417_v50, %v2354_v3  ;;  %v502_v36 = vsub.f32 %v416_v40, %v2336_v37  ;;  %v2544_v37 = vld [vmem:[%s3646_s1 + $0x60] sm:$0xff] }
 0x10c   :  { %v586_v34 = vadd.f32 0.001, %v543_v61  ;;  %v289_v49 = vpop.xlane.xlu1 %288  ;;  %845 = vrot.lane.b32.xlu0 %v751_v5, %s1704_s15  ;;  %v748_v13 = vmul.f32 %v2507_v63, %v2238_v17  ;;  %v286_v25 = vpop.xlane.xlu0 %285  ;;  %v2536_v59 = vmul.f32 %v1590_v52, %v2517_v14  ;;  %v2539_v60 = vmul.f32 %v1588_v7, %v2512_v10  ;;  %3715 = vst [vmem:[#allocation27_spill] sm:$0xff] %v2544_v37  ;;  %v2549_v17 = vld [vmem:[%s3646_s1 + $0x48] sm:$0xff] }
 0x10d   :  { %v1592_v11 = vpop.eup %1591  ;;  %1601 = vrsqrt.f32 %v587_v43  ;;  %v546_v26 = vmax.f32 %v503_v56, 0.0  ;;  %v545_v3 = vmax.f32 %v502_v36, 0.0  ;;  %v419_v50 = vmul.f32 0.020408163, %v289_v49  ;;  %3716 = vst [vmem:[#allocation28_spill] sm:$0xff] %v2549_v17 }
 0x10e   :  { %v2552_v40 = vmul.f32 0.020408163, %v2205_v44  ;;  %v2555_v7 = vmul.f32 0.020408163, %v2207_v0  ;;  %839 = vrot.lane.b32.xlu1 %v748_v13, %s1704_s15  ;;  %v418_v61 = vmul.f32 0.020408163, %v286_v25  ;;  %v753_v5 = vmul.f32 %v2536_v59, %v2266_v30 }
 0x10f   :  { %v1594_v52 = vpop.eup %1593  ;;  %1603 = vrsqrt.f32 %v586_v34  ;;  %v589_v43 = vadd.f32 0.001, %v546_v26  ;;  %v588_v56 = vadd.f32 0.001, %v545_v3  ;;  %v505_v36 = vsub.f32 %v419_v50, %v2366_v35  ;;  %v2574_v34 = vld [vmem:[%s3646_s1 + $0x58] sm:$0xff] }
 0x110   :  { %v504_v49 = vsub.f32 %v418_v61, %v2350_v4  ;;  %v295_v10 = vpop.xlane.xlu1 %294  ;;  %849 = vrot.lane.b32.xlu0 %v753_v5, %s1704_s15  ;;  %v750_v44 = vmul.f32 %v2539_v60, %v2244_v22  ;;  %v292_v0 = vpop.xlane.xlu0 %291  ;;  %v2566_v13 = vmul.f32 %v1594_v52, %v2544_v37  ;;  %v2569_v30 = vmul.f32 %v1592_v11, %v2549_v17  ;;  %v2579_v22 = vld [vmem:[%s3646_s1 + $0x70] sm:$0xff] }
 0x111   :  { %3717 = vst [vmem:[#allocation29_spill] sm:$0xff] %v2574_v34  ;;  %v1596_v35 = vpop.eup %1595  ;;  %1605 = vrsqrt.f32 %v589_v43  ;;  %v548_v4 = vmax.f32 %v505_v36, 0.0  ;;  %v421_v25 = vmul.f32 0.020408163, %v295_v10  ;;  %v420_v26 = vmul.f32 0.020408163, %v292_v0 }
 0x112   :  { %3718 = vst [vmem:[#allocation30_spill] sm:$0xff] %v2579_v22  ;;  %v2583_v3 = vmul.f32 %v2552_v40, %v2552_v40  ;;  %v2587_v11 = vmul.f32 %v2555_v7, %v2555_v7  ;;  %v547_v50 = vmax.f32 %v504_v49, 0.0  ;;  %843 = vrot.lane.b32.xlu1 %v750_v44, %s1704_s15  ;;  %v755_v10 = vmul.f32 %v2566_v13, %v2286_v39 }
 0x113   :  { %v1598_v61 = vpop.eup %1597  ;;  %1607 = vrsqrt.f32 %v588_v56  ;;  %v591_v5 = vadd.f32 0.001, %v548_v4  ;;  %v507_v52 = vsub.f32 %v421_v25, %v2396_v21  ;;  %v506_v43 = vsub.f32 %v420_v26, %v2362_v47  ;;  %v2606_v47 = vld [vmem:[%s3646_s1 + $0x80] sm:$0xff] }
 0x114   :  { %v590_v36 = vadd.f32 0.001, %v547_v50  ;;  %v301_v0 = vpop.xlane.xlu1 %300  ;;  %853 = vrot.lane.b32.xlu0 %v755_v10, %s1704_s15  ;;  %v752_v17 = vmul.f32 %v2569_v30, %v2249_v57  ;;  %v298_v49 = vpop.xlane.xlu0 %297  ;;  %v2598_v44 = vmul.f32 %v1598_v61, %v2579_v22  ;;  %v2601_v39 = vmul.f32 %v1596_v35, %v2574_v34  ;;  %3719 = vst [vmem:[#allocation31_spill] sm:$0xff] %v2606_v47  ;;  %v2611_v57 = vld [vmem:[%s3646_s1 + $0x68] sm:$0xff] }
 0x115   :  { %v1600_v56 = vpop.eup %1599  ;;  %1609 = vrsqrt.f32 %v591_v5  ;;  %v550_v4 = vmax.f32 %v507_v52, 0.0  ;;  %v549_v21 = vmax.f32 %v506_v43, 0.0  ;;  %v423_v25 = vmul.f32 0.020408163, %v301_v0  ;;  %3720 = vst [vmem:[#allocation32_spill] sm:$0xff] %v2611_v57 }
 0x116   :  { %v2614_v26 = vmul.f32 0.020408163, %v2209_v53  ;;  %v2617_v35 = vmul.f32 0.020408163, %v2211_v48  ;;  %847 = vrot.lane.b32.xlu1 %v752_v17, %s1704_s15  ;;  %v422_v50 = vmul.f32 0.020408163, %v298_v49  ;;  %v757_v10 = vmul.f32 %v2598_v44, %v2304_v46 }
 0x117   :  { %v1602_v61 = vpop.eup %1601  ;;  %1611 = vrsqrt.f32 %v590_v36  ;;  %v593_v5 = vadd.f32 0.001, %v550_v4  ;;  %v592_v52 = vadd.f32 0.001, %v549_v21  ;;  %v509_v43 = vsub.f32 %v423_v25, %v2411_v31  ;;  %v2636_v36 = vld [vmem:[%s3646_s1 + $0x78] sm:$0xff] }
 0x118   :  { %v508_v0 = vsub.f32 %v422_v50, %v2376_v42  ;;  %v307_v34 = vpop.xlane.xlu1 %306  ;;  %857 = vrot.lane.b32.xlu0 %v757_v10, %s1704_s15  ;;  %v754_v53 = vmul.f32 %v2601_v39, %v2264_v16  ;;  %v304_v48 = vpop.xlane.xlu0 %303  ;;  %v2628_v17 = vmul.f32 %v1602_v61, %v2606_v47  ;;  %v2631_v46 = vmul.f32 %v1600_v56, %v2611_v57  ;;  %v2641_v16 = vld [vmem:[%s3646_s1 + $0x90] sm:$0xff] }
 0x119   :  { %3721 = vst [vmem:[#allocation33_spill] sm:$0xff] %v2636_v36  ;;  %v1604_v31 = vpop.eup %1603  ;;  %1613 = vrsqrt.f32 %v593_v5  ;;  %v552_v42 = vmax.f32 %v509_v43, 0.0  ;;  %v425_v49 = vmul.f32 0.020408163, %v307_v34  ;;  %v424_v4 = vmul.f32 0.020408163, %v304_v48 }
 0x11a   :  { %3722 = vst [vmem:[#allocation34_spill] sm:$0xff] %v2641_v16  ;;  %v2645_v21 = vmul.f32 %v2614_v26, %v2614_v26  ;;  %v2649_v56 = vmul.f32 %v2617_v35, %v2617_v35  ;;  %v551_v25 = vmax.f32 %v508_v0, 0.0  ;;  %851 = vrot.lane.b32.xlu1 %v754_v53, %s1704_s15  ;;  %v759_v34 = vmul.f32 %v2628_v17, %v2318_v28 }
 0x11b   :  { %v1606_v50 = vpop.eup %1605  ;;  %1615 = vrsqrt.f32 %v592_v52  ;;  %v595_v10 = vadd.f32 0.001, %v552_v42  ;;  %v511_v61 = vsub.f32 %v425_v49, %v2419_v8  ;;  %v510_v5 = vsub.f32 %v424_v4, %v2400_v55  ;;  %v2668_v55 = vld [vmem:[%s3646_s1 + $0xa0] sm:$0xff] }
 0x11c   :  { %v594_v43 = vadd.f32 0.001, %v551_v25  ;;  %v313_v48 = vpop.xlane.xlu1 %312  ;;  %861 = vrot.lane.b32.xlu0 %v759_v34, %s1704_s15  ;;  %v756_v57 = vmul.f32 %v2631_v46, %v2284_v27  ;;  %v310_v0 = vpop.xlane.xlu0 %309  ;;  %v2660_v53 = vmul.f32 %v1606_v50, %v2641_v16  ;;  %v2663_v28 = vmul.f32 %v1604_v31, %v2636_v36  ;;  %3723 = vst [vmem:[#allocation35_spill] sm:$0xff] %v2668_v55  ;;  %v2673_v27 = vld [vmem:[%s3646_s1 + $0x88] sm:$0xff]  ;;  %v3725_v31 = vld [vmem:[#allocation2_spill] sm:$0xff] }
 0x11d   :  { %v1608_v52 = vpop.eup %1607  ;;  %1617 = vrsqrt.f32 %v595_v10  ;;  %v554_v42 = vmax.f32 %v511_v61, 0.0  ;;  %v553_v8 = vmax.f32 %v510_v5, 0.0  ;;  %v427_v49 = vmul.f32 0.020408163, %v313_v48  ;;  %3724 = vst [vmem:[#allocation36_spill] sm:$0xff] %v2673_v27  ;;  %v3726_v50 = vld [vmem:[#allocation11_spill] sm:$0xff] }
 0x11e   :  { %v2676_v4 = vmul.f32 0.020408163, %v2213_v62  ;;  %v2679_v25 = vmul.f32 0.020408163, %v3725_v31  ;;  %855 = vrot.lane.b32.xlu1 %v756_v57, %s1704_s15  ;;  %v426_v34 = vmul.f32 0.020408163, %v310_v0  ;;  %v761_v10 = vmul.f32 %v2660_v53, %v3726_v50 }
 0x11f   :  { %v1610_v61 = vpop.eup %1609  ;;  %1619 = vrsqrt.f32 %v594_v43  ;;  %v597_v5 = vadd.f32 0.001, %v554_v42  ;;  %v596_v48 = vadd.f32 0.001, %v553_v8  ;;  %v513_v36 = vsub.f32 %v427_v49, %v2463_v6  ;;  %v3727_v62 = vld [vmem:[#allocation8_spill] sm:$0xff]  ;;  %v2698_v43 = vld [vmem:[%s3646_s1 + $0x98] sm:$0xff] }
 0x120   :  { %v512_v16 = vsub.f32 %v426_v34, %v2415_v32  ;;  %v319_v47 = vpop.xlane.xlu1 %318  ;;  %865 = vrot.lane.b32.xlu0 %v761_v10, %s1704_s15  ;;  %v758_v31 = vmul.f32 %v2663_v28, %v3727_v62  ;;  %v316_v22 = vpop.xlane.xlu0 %315  ;;  %v2690_v57 = vmul.f32 %v1610_v61, %v2668_v55  ;;  %v2693_v0 = vmul.f32 %v1608_v52, %v2673_v27  ;;  %v2703_v49 = vld [vmem:[%s3646_s1 + $0xb0] sm:$0xff]  ;;  %v3730_v10 = vld [vmem:[#allocation13_spill] sm:$0xff] }
 0x121   :  { %3728 = vst [vmem:[#allocation2_spill] sm:$0xff] %v2698_v43  ;;  %v1612_v6 = vpop.eup %1611  ;;  %1621 = vrsqrt.f32 %v597_v5  ;;  %v556_v32 = vmax.f32 %v513_v36, 0.0  ;;  %v429_v42 = vmul.f32 0.020408163, %v319_v47  ;;  %v428_v8 = vmul.f32 0.020408163, %v316_v22 }
 0x122   :  { %3729 = vst [vmem:[#allocation11_spill] sm:$0xff] %v2703_v49  ;;  %v2707_v34 = vmul.f32 %v2676_v4, %v2676_v4  ;;  %v2711_v52 = vmul.f32 %v2679_v25, %v2679_v25  ;;  %v555_v50 = vmax.f32 %v512_v16, 0.0  ;;  %859 = vrot.lane.b32.xlu1 %v758_v31, %s1704_s15  ;;  %v763_v47 = vmul.f32 %v2690_v57, %v3730_v10  ;;  %v3731_v55 = vld [vmem:[#allocation9_spill] sm:$0xff] }
 0x123   :  { %v1614_v22 = vpop.eup %1613  ;;  %1623 = vrsqrt.f32 %v596_v48  ;;  %v599_v36 = vadd.f32 0.001, %v556_v32  ;;  %v515_v61 = vsub.f32 %v429_v42, %v2525_v51  ;;  %v514_v5 = vsub.f32 %v428_v8, %v2459_v38  ;;  %v2730_v38 = vld [vmem:[%s3646_s1 + $0xc0] sm:$0xff]  ;;  %v3734_v8 = vld [vmem:[#allocation3_spill] sm:$0xff] }
 0x124   :  { %v598_v62 = vadd.f32 0.001, %v555_v50  ;;  %v325_v27 = vpop.xlane.xlu1 %324  ;;  %869 = vrot.lane.b32.xlu0 %v763_v47, %s1704_s15  ;;  %v760_v37 = vmul.f32 %v2693_v0, %v3731_v55  ;;  %v322_v16 = vpop.xlane.xlu0 %321  ;;  %v2722_v31 = vmul.f32 %v1614_v22, %v2703_v49  ;;  %v2725_v10 = vmul.f32 %v1612_v6, %v2698_v43  ;;  %3732 = vst [vmem:[#allocation8_spill] sm:$0xff] %v2730_v38  ;;  %v2735_v55 = vld [vmem:[%s3646_s1 + $0xa8] sm:$0xff]  ;;  %v3735_v6 = vld [vmem:[#allocation4_spill] sm:$0xff] }
 0x125   :  { %v1616_v48 = vpop.eup %1615  ;;  %1625 = vrsqrt.f32 %v599_v36  ;;  %v558_v32 = vmax.f32 %v515_v61, 0.0  ;;  %v557_v51 = vmax.f32 %v514_v5, 0.0  ;;  %v431_v42 = vmul.f32 0.020408163, %v325_v27  ;;  %3733 = vst [vmem:[#allocation13_spill] sm:$0xff] %v2735_v55 }
 0x126   :  { %v2738_v50 = vmul.f32 0.020408163, %v3734_v8  ;;  %v2741_v47 = vmul.f32 0.020408163, %v3735_v6  ;;  %863 = vrot.lane.b32.xlu1 %v760_v37, %s1704_s15  ;;  %v430_v22 = vmul.f32 0.020408163, %v322_v16  ;;  %v765_v27 = vmul.f32 %v2722_v31, %v2369_v18 }
 0x127   :  { %v1618_v36 = vpop.eup %1617  ;;  %1627 = vrsqrt.f32 %v598_v62  ;;  %v601_v61 = vadd.f32 0.001, %v558_v32  ;;  %v600_v5 = vadd.f32 0.001, %v557_v51  ;;  %v517_v43 = vsub.f32 %v431_v42, %v2587_v11  ;;  %v3736_v8 = vld [vmem:[#allocation10_spill] sm:$0xff]  ;;  %v2760_v62 = vld [vmem:[%s3646_s1 + $0xb8] sm:$0xff] }
 0x128   :  { %v516_v49 = vsub.f32 %v430_v22, %v2521_v33  ;;  %v331_v9 = vpop.xlane.xlu1 %330  ;;  %873 = vrot.lane.b32.xlu0 %v765_v27, %s1704_s15  ;;  %v762_v6 = vmul.f32 %v2725_v10, %v3736_v8  ;;  %v328_v14 = vpop.xlane.xlu0 %327  ;;  %v2752_v37 = vmul.f32 %v1618_v36, %v2730_v38  ;;  %v2755_v18 = vmul.f32 %v1616_v48, %v2735_v55  ;;  %v2765_v51 = vld [vmem:[%s3646_s1 + $0xd0] sm:$0xff] }
 0x129   :  { %3738 = vst [vmem:[#allocation3_spill] sm:$0xff] %v2760_v62  ;;  %v1620_v11 = vpop.eup %1619  ;;  %1629 = vrsqrt.f32 %v601_v61  ;;  %v560_v33 = vmax.f32 %v517_v43, 0.0  ;;  %v433_v16 = vmul.f32 0.020408163, %v331_v9  ;;  %v432_v32 = vmul.f32 0.020408163, %v328_v14 }
 0x12a   :  { %3737 = vst [vmem:[#allocation9_spill] sm:$0xff] %v2755_v18  ;;  %3739 = vst [vmem:[#allocation4_spill] sm:$0xff] %v2765_v51  ;;  %v2769_v42 = vmul.f32 %v2738_v50, %v2738_v50  ;;  %v2773_v48 = vmul.f32 %v2741_v47, %v2741_v47  ;;  %v559_v22 = vmax.f32 %v516_v49, 0.0  ;;  %867 = vrot.lane.b32.xlu1 %v762_v6, %s1704_s15  ;;  %v3740_v27 = vld [vmem:[#allocation16_spill] sm:$0xff]  ;;  %1631 = vrsqrt.f32 %v600_v5 }
 0x12b   :  { %v767_v9 = vmul.f32 %v2752_v37, %v3740_v27  ;;  %v1622_v14 = vpop.eup %1621  ;;  %v603_v43 = vadd.f32 0.001, %v560_v33  ;;  %v519_v36 = vsub.f32 %v433_v16, %v2649_v56  ;;  %v518_v61 = vsub.f32 %v432_v32, %v2583_v3  ;;  %v3741_v38 = vld [vmem:[#allocation12_spill] sm:$0xff]  ;;  %v2792_v3 = vld [vmem:[%s3646_s1 + $0xe0] sm:$0xff]  ;;  %v3745_v32 = vld [vmem:[#allocation5_spill] sm:$0xff] }
 0x12c   :  { %v602_v8 = vadd.f32 0.001, %v559_v22  ;;  %v337_v55 = vpop.xlane.xlu1 %336  ;;  %v764_v29 = vmul.f32 %v2755_v18, %v3741_v38  ;;  %v334_v49 = vpop.xlane.xlu0 %333  ;;  %v2784_v6 = vmul.f32 %v1622_v14, %v2765_v51  ;;  %v2787_v27 = vmul.f32 %v1620_v11, %v2760_v62  ;;  %3743 = vst [vmem:[#allocation16_spill] sm:$0xff] %v2792_v3  ;;  %v2797_v38 = vld [vmem:[%s3646_s1 + $0xc8] sm:$0xff]  ;;  %v3746_v11 = vld [vmem:[#allocation6_spill] sm:$0xff] }
 0x12d   :  { %877 = vrot.lane.b32.xlu0 %v767_v9, %s1704_s15  ;;  %v1624_v5 = vpop.eup %1623  ;;  %1633 = vrsqrt.f32 %v603_v43  ;;  %v562_v33 = vmax.f32 %v519_v36, 0.0  ;;  %v561_v56 = vmax.f32 %v518_v61, 0.0  ;;  %v435_v16 = vmul.f32 0.020408163, %v337_v55  ;;  %3744 = vst [vmem:[#allocation12_spill] sm:$0xff] %v2797_v38  ;;  %v3747_v55 = vld [vmem:[#allocation18_spill] sm:$0xff] }
 0x12e   :  { %3742 = vst [vmem:[#allocation10_spill] sm:$0xff] %v2787_v27  ;;  %v2800_v22 = vmul.f32 0.020408163, %v3745_v32  ;;  %v2803_v9 = vmul.f32 0.020408163, %v3746_v11  ;;  %871 = vrot.lane.b32.xlu1 %v764_v29, %s1704_s15  ;;  %v769_v43 = vmul.f32 %v2784_v6, %v3747_v55  ;;  %1635 = vrsqrt.f32 %v602_v8  ;;  %v3748_v32 = vld [vmem:[#allocation14_spill] sm:$0xff] }
 0x12f   :  { %v434_v14 = vmul.f32 0.020408163, %v334_v49  ;;  %v1626_v36 = vpop.eup %1625  ;;  %v605_v61 = vadd.f32 0.001, %v562_v33  ;;  %v604_v62 = vadd.f32 0.001, %v561_v56  ;;  %v521_v51 = vsub.f32 %v435_v16, %v2711_v52 }
 0x130   :  { %v343_v54 = vpop.xlane.xlu1 %342  ;;  %v766_v11 = vmul.f32 %v2787_v27, %v3748_v32  ;;  %v340_v18 = vpop.xlane.xlu0 %339  ;;  %v2814_v29 = vmul.f32 %v1626_v36, %v2792_v3  ;;  %v2817_v49 = vmul.f32 %v1624_v5, %v2797_v38  ;;  %v2822_v8 = vld [vmem:[%s3646_s1 + $0xd8] sm:$0xff]  ;;  %v2827_v16 = vld [vmem:[%s3646_s1 + $0xf0] sm:$0xff]  ;;  %v3752_v5 = vld [vmem:[#allocation7_spill] sm:$0xff] }
 0x131   :  { %v520_v15 = vsub.f32 %v434_v14, %v2645_v21  ;;  %881 = vrot.lane.b32.xlu0 %v769_v43, %s1704_s15  ;;  %3750 = vst [vmem:[#allocation6_spill] sm:$0xff] %v2822_v8  ;;  %v1628_v52 = vpop.eup %1627  ;;  %1637 = vrsqrt.f32 %v605_v61  ;;  %v564_v21 = vmax.f32 %v521_v51, 0.0  ;;  %v437_v33 = vmul.f32 0.020408163, %v343_v54  ;;  %3751 = vst [vmem:[#allocation18_spill] sm:$0xff] %v2827_v16  ;;  %v3753_v3 = vld [vmem:[#allocation15_spill] sm:$0xff] }
 0x132   :  { %3749 = vst [vmem:[#allocation5_spill] sm:$0xff] %v2817_v49  ;;  %v436_v56 = vmul.f32 0.020408163, %v340_v18  ;;  %v482_v14 = vmul.f32 %v2803_v9, %v2803_v9  ;;  %v2832_v55 = vmul.f32 0.020408163, %v3752_v5  ;;  %875 = vrot.lane.b32.xlu1 %v766_v11, %s1704_s15  ;;  %v771_v36 = vmul.f32 %v2814_v29, %v2434_v45 }
 0x133   :  { %v563_v43 = vmax.f32 %v520_v15, 0.0  ;;  %v1630_v51 = vpop.eup %1629  ;;  %1639 = vrsqrt.f32 %v604_v62  ;;  %v607_v54 = vadd.f32 0.001, %v564_v21  ;;  %v523_v18 = vsub.f32 %v437_v33, %v2773_v48 }
 0x134   :  { %v522_v61 = vsub.f32 %v436_v56, %v2707_v34  ;;  %v349_v38 = vpop.xlane.xlu1 %348  ;;  %v768_v5 = vmul.f32 %v2817_v49, %v3753_v3  ;;  %v346_v15 = vpop.xlane.xlu0 %345  ;;  %v2843_v11 = vmul.f32 %v1630_v51, %v2827_v16  ;;  %v2846_v45 = vmul.f32 %v1628_v52, %v2822_v8  ;;  %v2851_v34 = vld [vmem:[%s3646_s1 + $0x100] sm:$0xff]  ;;  %v2856_v3 = vld [vmem:[%s3646_s1 + $0xe8] sm:$0xff]  ;;  %v3754_v16 = vld [vmem:[#allocation17_spill] sm:$0xff] }
 0x135   :  { %v606_v32 = vadd.f32 0.001, %v563_v43  ;;  %885 = vrot.lane.b32.xlu0 %v771_v36, %s1704_s15  ;;  %v1632_v62 = vpop.eup %1631  ;;  %1641 = vrsqrt.f32 %v607_v54  ;;  %v566_v21 = vmax.f32 %v523_v18, 0.0  ;;  %v439_v33 = vmul.f32 0.020408163, %v349_v38 }
 0x136   :  { %v565_v48 = vmax.f32 %v522_v61, 0.0  ;;  %v483_v56 = vmul.f32 %v2800_v22, %v2800_v22  ;;  %v484_v52 = vmul.f32 %v2832_v55, %v2832_v55  ;;  %879 = vrot.lane.b32.xlu1 %v768_v5, %s1704_s15  ;;  %v438_v43 = vmul.f32 0.020408163, %v346_v15 }
 0x137   :  { %v773_v38 = vmul.f32 %v2843_v11, %v2493_v19  ;;  %v1634_v36 = vpop.eup %1633  ;;  %1643 = vrsqrt.f32 %v606_v32  ;;  %v609_v51 = vadd.f32 0.001, %v566_v21  ;;  %v525_v18 = vsub.f32 %v439_v33, %v482_v14  ;;  %v2878_v19 = vld [vmem:[%s3646_s1 + $0xf8] sm:$0xff] }
 0x138   :  { %v608_v54 = vadd.f32 0.001, %v565_v48  ;;  %v524_v61 = vsub.f32 %v438_v43, %v2769_v42  ;;  %v355_v8 = vpop.xlane.xlu1 %354  ;;  %v770_v49 = vmul.f32 %v2846_v45, %v3754_v16  ;;  %v352_v27 = vpop.xlane.xlu0 %351  ;;  %v2870_v5 = vmul.f32 %v1634_v36, %v2851_v34  ;;  %v2883_v16 = vld [vmem:[%s3646_s1 + $0x110] sm:$0xff] }
 0x139   :  { %889 = vrot.lane.b32.xlu0 %v773_v38, %s1704_s15  ;;  %v2873_v15 = vmul.f32 %v1632_v62, %v2856_v3  ;;  %v1636_v14 = vpop.eup %1635  ;;  %1645 = vrsqrt.f32 %v609_v51  ;;  %v568_v42 = vmax.f32 %v525_v18, 0.0  ;;  %v441_v32 = vmul.f32 0.020408163, %v355_v8 }
 0x13a   :  { %v440_v21 = vmul.f32 0.020408163, %v352_v27  ;;  %v567_v48 = vmax.f32 %v524_v61, 0.0  ;;  %883 = vrot.lane.b32.xlu1 %v770_v49, %s1704_s15  ;;  %v775_v62 = vmul.f32 %v2870_v5, %v2555_v7  ;;  %1647 = vrsqrt.f32 %v608_v54 }
 0x13b   :  { %v1638_v33 = vpop.eup %1637  ;;  %v611_v43 = vadd.f32 0.001, %v568_v42  ;;  %v527_v38 = vsub.f32 %v441_v32, %v484_v52  ;;  %v772_v27 = vmul.f32 %v2873_v15, %v2431_v1  ;;  %v2895_v18 = vmul.f32 %v1636_v14, %v2878_v19  ;;  %v2905_v52 = vld [vmem:[%s3646_s1 + $0x108] sm:$0xff] }
 0x13c   :  { %v526_v36 = vsub.f32 %v440_v21, %v483_v56  ;;  %v610_v51 = vadd.f32 0.001, %v567_v48  ;;  %v2892_v8 = vmul.f32 %v1638_v33, %v2883_v16  ;;  %v2900_v56 = vld [vmem:[%s3646_s1 + $0x120] sm:$0xff]  ;;  %v2927_v33 = vld [vmem:[%s3646_s1 + $0x118] sm:$0xff] }
 0x13d   :  { %893 = vrot.lane.b32.xlu0 %v775_v62, %s1704_s15  ;;  %v1640_v49 = vpop.eup %1639  ;;  %1649 = vrsqrt.f32 %v611_v43  ;;  %v570_v7 = vmax.f32 %v527_v38, 0.0  ;;  %v774_v32 = vmul.f32 %v2895_v18, %v2490_v23 }
 0x13e   :  { %v569_v61 = vmax.f32 %v526_v36, 0.0  ;;  %887 = vrot.lane.b32.xlu1 %v772_v27, %s1704_s15  ;;  %v777_v1 = vmul.f32 %v2892_v8, %v2617_v35  ;;  %1651 = vrsqrt.f32 %v610_v51  ;;  %v2917_v48 = vmul.f32 %v1640_v49, %v2905_v52  ;;  %v2922_v35 = vld [vmem:[%s3646_s1 + $0x130] sm:$0xff]  ;;  %v2944_v49 = vld [vmem:[%s3646_s1 + $0x140] sm:$0xff] }
 0x13f   :  { %v1642_v54 = vpop.eup %1641  ;;  %v613_v14 = vadd.f32 0.001, %v570_v7 }
 0x140   :  { %v612_v42 = vadd.f32 0.001, %v569_v61  ;;  %v2914_v21 = vmul.f32 %v1642_v54, %v2900_v56  ;;  %v776_v38 = vmul.f32 %v2917_v48, %v2552_v40 }
 0x141   :  { %897 = vrot.lane.b32.xlu0 %v777_v1, %s1704_s15  ;;  %v1644_v62 = vpop.eup %1643  ;;  %1653 = vrsqrt.f32 %v613_v14 }
 0x142   :  { %891 = vrot.lane.b32.xlu1 %v774_v32, %s1704_s15  ;;  %v779_v23 = vmul.f32 %v2914_v21, %v2679_v25  ;;  %1655 = vrsqrt.f32 %v612_v42  ;;  %v2939_v51 = vmul.f32 %v1644_v62, %v2927_v33  ;;  %v2949_v25 = vld [vmem:[%s3646_s1 + $0x128] sm:$0xff]  ;;  %v2966_v42 = vld [vmem:[%s3646_s1 + $0x150] sm:$0xff] }
 0x143   :  { %v1646_v43 = vpop.eup %1645 }
 0x144   :  { %v2936_v36 = vmul.f32 %v1646_v43, %v2922_v35  ;;  %v1648_v27 = vpop.eup %1647  ;;  %v778_v61 = vmul.f32 %v2939_v51, %v2614_v26 }
 0x145   :  { %901 = vrot.lane.b32.xlu0 %v779_v23, %s1704_s15  ;;  %v2961_v54 = vmul.f32 %v1648_v27, %v2949_v25  ;;  %v2988_v27 = vld [vmem:[%s3646_s1 + $0x148] sm:$0xff] }
 0x146   :  { %895 = vrot.lane.b32.xlu1 %v776_v38, %s1704_s15  ;;  %v781_v40 = vmul.f32 %v2936_v36, %v2741_v47  ;;  %v2971_v47 = vld [vmem:[%s3646_s1 + $0x138] sm:$0xff] }
 0x147   :  { %v1650_v7 = vpop.eup %1649  ;;  %v780_v62 = vmul.f32 %v2961_v54, %v2676_v4 }
 0x148   :  { %v2958_v1 = vmul.f32 %v1650_v7, %v2944_v49  ;;  %v1652_v14 = vpop.eup %1651 }
 0x149   :  { %905 = vrot.lane.b32.xlu0 %v781_v40, %s1704_s15  ;;  %v2983_v43 = vmul.f32 %v1652_v14, %v2971_v47 }
 0x14a   :  { %899 = vrot.lane.b32.xlu1 %v778_v61, %s1704_s15  ;;  %v783_v26 = vmul.f32 %v2958_v1, %v2803_v9 }
 0x14b   :  { %v1654_v32 = vpop.eup %1653  ;;  %v782_v4 = vmul.f32 %v2983_v43, %v2738_v50 }
 0x14c   :  { %v2980_v23 = vmul.f32 %v1654_v32, %v2966_v42  ;;  %v1656_v38 = vpop.eup %1655 }
 0x14d   :  { %909 = vrot.lane.b32.xlu0 %v783_v26, %s1704_s15  ;;  %v2997_v40 = vmul.f32 %v1656_v38, %v2988_v27  ;;  %v1658_v26 = vld [vmem:[%s3646_s1] sm:$0xff] }
 0x14e   :  { %903 = vrot.lane.b32.xlu1 %v780_v62, %s1704_s15  ;;  %v785_v9 = vmul.f32 %v2980_v23, %v2832_v55  ;;  %v3755_v55 = vld [vmem:[#allocation19_spill] sm:$0xff] }
 0x14f   :  { %v784_v7 = vmul.f32 %v2997_v40, %v2800_v22 }
 0x151   :  { %913 = vrot.lane.b32.xlu0 %v785_v9, %s1704_s15  ;;  %v1659_v9 = vld [vmem:[%s3646_s1 + $0x10] sm:$0xff] }
 0x152   :  { %907 = vrot.lane.b32.xlu1 %v782_v4, %s1704_s15 }
 0x155   :  { %1008 = vperm.xlu0 %1568, %v2436_v24  }
 0x156   :  { %911 = vrot.lane.b32.xlu1 %v784_v7, %s1704_s15 }
 0x159   :  { %1023 = vperm.xlu0 %1568, %v2443_v41  }
 0x15a   :  { %1003 = vperm.xlu1 %1567, %v3755_v55  }
 0x15d   :  { %1033 = vperm.xlu0 %1568, %v2474_v2  }
 0x15e   :  { %1013 = vperm.xlu1 %1567, %v2445_v58  }
 0x161   :  { %1043 = vperm.xlu0 %1568, %v2504_v20  }
 0x162   :  { %1018 = vperm.xlu1 %1567, %v2477_v12  }
 0x165   :  { %1053 = vperm.xlu0 %1568, %v2536_v59  }
 0x166   :  { %1028 = vperm.xlu1 %1567, %v2507_v63  }
 0x169   :  { %1063 = vperm.xlu0 %1568, %v2566_v13  }
 0x16a   :  { %1038 = vperm.xlu1 %1567, %v2539_v60  }
 0x16d   :  { %1073 = vperm.xlu0 %1568, %v2598_v44  }
 0x16e   :  { %1048 = vperm.xlu1 %1567, %v2569_v30   ;;  %v3017_v41 = vpop.permute.xlu0 %829  ;;  %v3756_v30 = vld [vmem:[#allocation9_spill] sm:$0xff] }
 0x16f   :  { %v958_v32 = vsub.f32 %v1658_v26, %v3017_v41  ;;  %v3771_v26 = vld [vmem:[#allocation29_spill] sm:$0xff] }
 0x171   :  { %1083 = vperm.xlu0 %1568, %v2628_v17   ;;  %v3757_v17 = vld [vmem:[#allocation10_spill] sm:$0xff] }
 0x172   :  { %1058 = vperm.xlu1 %1567, %v2601_v39  }
 0x174   :  { %v832_v24 = vpop.permute.xlu1 %831 }
 0x175   :  { %1093 = vperm.xlu0 %1568, %v2660_v53  }
 0x176   :  { %1068 = vperm.xlu1 %1567, %v2631_v46   ;;  %v838_v58 = vpop.permute.xlu0 %837 }
 0x178   :  { %v3022_v2 = vpop.permute.xlu1 %833 }
 0x179   :  { %1103 = vperm.xlu0 %1568, %v2690_v57   ;;  %v960_v4 = vsub.f32 %v1659_v9, %v3022_v2  ;;  %v3773_v9 = vld [vmem:[#allocation32_spill] sm:$0xff] }
 0x17a   :  { %1078 = vperm.xlu1 %1567, %v2663_v28   ;;  %v842_v12 = vpop.permute.xlu0 %841  ;;  %v3758_v28 = vld [vmem:[#allocation5_spill] sm:$0xff] }
 0x17c   :  { %v3026_v20 = vpop.permute.xlu1 %835 }
 0x17d   :  { %1113 = vperm.xlu0 %1568, %v2722_v31  }
 0x17e   :  { %1088 = vperm.xlu1 %1567, %v2693_v0   ;;  %v3030_v63 = vpop.permute.xlu0 %845 }
 0x180   :  { %v3032_v59 = vpop.permute.xlu1 %839 }
 0x181   :  { %1123 = vperm.xlu0 %1568, %v2752_v37  }
 0x182   :  { %1098 = vperm.xlu1 %1567, %v2725_v10   ;;  %v3036_v60 = vpop.permute.xlu0 %849 }
 0x184   :  { %v3038_v13 = vpop.permute.xlu1 %843 }
 0x185   :  { %1133 = vperm.xlu0 %1568, %v2784_v6  }
 0x186   :  { %1108 = vperm.xlu1 %1567, %v3756_v30   ;;  %v3042_v44 = vpop.permute.xlu0 %853  ;;  %v3765_v30 = vld [vmem:[#allocation24_spill] sm:$0xff] }
 0x187   :  { %v963_v2 = vsub.f32 %v3765_v30, %v3032_v59  ;;  %v3769_v59 = vld [vmem:[#allocation28_spill] sm:$0xff] }
 0x188   :  { %v3044_v39 = vpop.permute.xlu1 %847 }
 0x189   :  { %1143 = vperm.xlu0 %1568, %v2814_v29  }
 0x18a   :  { %1118 = vperm.xlu1 %1567, %v3757_v17   ;;  %v3048_v46 = vpop.permute.xlu0 %857 }
 0x18c   :  { %v3050_v53 = vpop.permute.xlu1 %851 }
 0x18d   :  { %1153 = vperm.xlu0 %1568, %v2843_v11  }
 0x18e   :  { %1128 = vperm.xlu1 %1567, %v3758_v28   ;;  %v3054_v57 = vpop.permute.xlu0 %861 }
 0x190   :  { %v3056_v0 = vpop.permute.xlu1 %855 }
 0x191   :  { %1163 = vperm.xlu0 %1568, %v2870_v5  }
 0x192   :  { %1138 = vperm.xlu1 %1567, %v2846_v45   ;;  %v3060_v31 = vpop.permute.xlu0 %865 }
 0x194   :  { %v3062_v10 = vpop.permute.xlu1 %859 }
 0x195   :  { %1173 = vperm.xlu0 %1568, %v2892_v8   ;;  %v1657_v8 = vld [vmem:[%s3646_s1 + $0x8] sm:$0xff] }
 0x196   :  { %1148 = vperm.xlu1 %1567, %v2873_v15   ;;  %v3066_v50 = vpop.permute.xlu0 %869 }
 0x198   :  { %v3068_v37 = vpop.permute.xlu1 %863 }
 0x199   :  { %1183 = vperm.xlu0 %1568, %v2914_v21  }
 0x19a   :  { %1158 = vperm.xlu1 %1567, %v2895_v18   ;;  %v3072_v6 = vpop.permute.xlu0 %873  ;;  %v959_v18 = vsub.f32 %v1657_v8, %v832_v24  ;;  %v3763_v24 = vld [vmem:[#allocation21_spill] sm:$0xff] }
 0x19c   :  { %v3074_v22 = vpop.permute.xlu1 %867 }
 0x19d   :  { %1193 = vperm.xlu0 %1568, %v2936_v36   ;;  %v3759_v36 = vld [vmem:[#allocation20_spill] sm:$0xff] }
 0x19e   :  { %1168 = vperm.xlu1 %1567, %v2917_v48   ;;  %v1705_v48 = vmov 1  }
 0x19f   :  { %v3078_v29 = vpop.permute.xlu0 %877 }
 0x1a0   :  { %v3080_v11 = vpop.permute.xlu1 %871 }
 0x1a1   :  { %1203 = vperm.xlu0 %1568, %v2958_v1  }
 0x1a2   :  { %1178 = vperm.xlu1 %1567, %v2939_v51   ;;  %v962_v51 = vsub.f32 %v3759_v36, %v838_v58  ;;  %v961_v58 = vsub.f32 %v3763_v24, %v3026_v20 }
 0x1a3   :  { %v3084_v45 = vpop.permute.xlu0 %881 }
 0x1a4   :  { %v3086_v5 = vpop.permute.xlu1 %875 }
 0x1a5   :  { %1213 = vperm.xlu0 %1568, %v2980_v23  }
 0x1a6   :  { %1188 = vperm.xlu1 %1567, %v2961_v54   ;;  %v3760_v54 = vld [vmem:[#allocation22_spill] sm:$0xff] }
 0x1a7   :  { %v3090_v15 = vpop.permute.xlu0 %885  ;;  %v964_v14 = vsub.f32 %v3760_v54, %v842_v12  ;;  %v3764_v12 = vld [vmem:[#allocation27_spill] sm:$0xff]  ;;  %v967_v54 = vsub.f32 %v3769_v59, %v3044_v39  ;;  %v971_v39 = vsub.f32 %v3773_v9, %v3056_v0  ;;  %v3777_v0 = vld [vmem:[#allocation36_spill] sm:$0xff]  ;;  %v3785_v9 = vld [vmem:[#allocation6_spill] sm:$0xff] }
 0x1a8   :  { %v3095_v21 = vpop.permute.xlu1 %879 }
 0x1a9   :  { %1570 = vset.pattern.permute.xlu0 %v1705_v48 }
 0x1aa   :  { %1266 = vperm.xlu0 %1570, %v959_v18   ;;  %1198 = vperm.xlu1 %1567, %v2983_v43   ;;  %v3761_v43 = vld [vmem:[#allocation23_spill] sm:$0xff]  ;;  %v3767_v18 = vld [vmem:[#allocation25_spill] sm:$0xff] }
 0x1ab   :  { %v3099_v61 = vpop.permute.xlu0 %889  ;;  %v966_v38 = vsub.f32 %v3761_v43, %v3030_v63  ;;  %v970_v63 = vsub.f32 %v3764_v12, %v3042_v44  ;;  %v965_v20 = vsub.f32 %v3767_v18, %v3038_v13  ;;  %v969_v13 = vsub.f32 %v3771_v26, %v3050_v53  ;;  %v3775_v53 = vld [vmem:[#allocation33_spill] sm:$0xff] }
 0x1ac   :  { %v3101_v1 = vpop.permute.xlu1 %883  ;;  %v973_v24 = vsub.f32 %v3775_v53, %v3062_v10  ;;  %v3779_v10 = vld [vmem:[#allocation2_spill] sm:$0xff] }
 0x1ae   :  { %1281 = vperm.xlu0 %1570, %v962_v51   ;;  %1208 = vperm.xlu1 %1567, %v2997_v40   ;;  %v3762_v40 = vld [vmem:[#allocation26_spill] sm:$0xff] }
 0x1af   :  { %v3111_v23 = vpop.permute.xlu0 %893  ;;  %v968_v7 = vsub.f32 %v3762_v40, %v3036_v60  ;;  %v3766_v60 = vld [vmem:[#allocation30_spill] sm:$0xff] }
 0x1b0   :  { %v3109_v62 = vpop.permute.xlu1 %887  ;;  %v972_v8 = vsub.f32 %v3766_v60, %v3048_v46 }
 0x1b2   :  { %1291 = vperm.xlu0 %1570, %v964_v14   ;;  %1569 = vset.pattern.permute.xlu1 %v1705_v48  ;;  %v3768_v48 = vld [vmem:[#allocation31_spill] sm:$0xff]  ;;  %v3770_v14 = vld [vmem:[#allocation34_spill] sm:$0xff] }
 0x1b3   :  { %1261 = vperm.xlu1 %1569, %v958_v32   ;;  %v3123_v41 = vpop.permute.xlu0 %897  ;;  %v974_v44 = vsub.f32 %v3768_v48, %v3054_v57  ;;  %v976_v46 = vsub.f32 %v3770_v14, %v3060_v31  ;;  %v3772_v57 = vld [vmem:[#allocation35_spill] sm:$0xff]  ;;  %v3781_v48 = vld [vmem:[#allocation13_spill] sm:$0xff] }
 0x1b4   :  { %v3121_v55 = vpop.permute.xlu1 %891  ;;  %v3783_v14 = vld [vmem:[#allocation3_spill] sm:$0xff] }
 0x1b6   :  { %1301 = vperm.xlu0 %1570, %v966_v38   ;;  %v978_v38 = vsub.f32 %v3772_v57, %v3066_v50 }
 0x1b7   :  { %1271 = vperm.xlu1 %1569, %v960_v4   ;;  %v3133_v28 = vpop.permute.xlu0 %901  ;;  %v3774_v4 = vld [vmem:[#allocation11_spill] sm:$0xff] }
 0x1b8   :  { %v3131_v17 = vpop.permute.xlu1 %895  ;;  %v980_v31 = vsub.f32 %v3774_v4, %v3072_v6  ;;  %v3778_v6 = vld [vmem:[#allocation4_spill] sm:$0xff] }
 0x1ba   :  { %1311 = vperm.xlu0 %1570, %v968_v7  }
 0x1bb   :  { %1276 = vperm.xlu1 %1569, %v961_v58   ;;  %v3143_v51 = vpop.permute.xlu0 %905  ;;  %v3776_v58 = vld [vmem:[#allocation8_spill] sm:$0xff] }
 0x1bc   :  { %v3141_v36 = vpop.permute.xlu1 %899  ;;  %v982_v50 = vsub.f32 %v3776_v58, %v3078_v29  ;;  %v3780_v29 = vld [vmem:[#allocation16_spill] sm:$0xff] }
 0x1be   :  { %1321 = vperm.xlu0 %1570, %v970_v63   ;;  %v975_v63 = vsub.f32 %v3777_v0, %v3068_v37 }
 0x1bf   :  { %1286 = vperm.xlu1 %1569, %v963_v2   ;;  %v3153_v43 = vpop.permute.xlu0 %909  ;;  %v984_v2 = vsub.f32 %v3778_v6, %v3084_v45  ;;  %v3782_v45 = vld [vmem:[#allocation18_spill] sm:$0xff] }
 0x1c0   :  { %v3151_v32 = vpop.permute.xlu1 %903 }
 0x1c2   :  { %1331 = vperm.xlu0 %1570, %v972_v8   ;;  %v977_v8 = vsub.f32 %v3779_v10, %v3074_v22 }
 0x1c3   :  { %1296 = vperm.xlu1 %1569, %v965_v20   ;;  %v3163_v7 = vpop.permute.xlu0 %913  ;;  %v986_v20 = vsub.f32 %v3780_v29, %v3090_v15  ;;  %v990_v15 = vsub.f32 %v2851_v34, %v3111_v23  ;;  %v994_v34 = vsub.f32 %v2900_v56, %v3133_v28  ;;  %v987_v23 = vsub.f32 %v2856_v3, %v3109_v62 }
 0x1c4   :  { %v3161_v40 = vpop.permute.xlu1 %907  ;;  %v998_v56 = vsub.f32 %v2944_v49, %v3153_v43  ;;  %v991_v62 = vsub.f32 %v2905_v52, %v3131_v17  ;;  %v995_v52 = vsub.f32 %v2949_v25, %v3151_v32 }
 0x1c6   :  { %1341 = vperm.xlu0 %1570, %v974_v44   ;;  %v979_v44 = vsub.f32 %v3781_v48, %v3080_v11  ;;  %v1660_v48 = vld [vmem:[%s3645_s0 + $0x8] sm:$0xff] }
 0x1c7   :  { %1306 = vperm.xlu1 %1569, %v967_v54   ;;  %v988_v54 = vsub.f32 %v3782_v45, %v3099_v61  ;;  %v992_v61 = vsub.f32 %v2883_v16, %v3123_v41  ;;  %v996_v16 = vsub.f32 %v2922_v35, %v3143_v51  ;;  %v989_v41 = vsub.f32 %v2878_v19, %v3121_v55 }
 0x1c8   :  { %v3173_v30 = vpop.permute.xlu1 %911  ;;  %v1000_v35 = vsub.f32 %v2966_v42, %v3163_v7  ;;  %v993_v55 = vsub.f32 %v2927_v33, %v3141_v36  ;;  %v997_v42 = vsub.f32 %v2971_v47, %v3161_v40 }
 0x1c9   :  { %v999_v36 = vsub.f32 %v2988_v27, %v3173_v30 }
 0x1ca   :  { %1351 = vperm.xlu0 %1570, %v976_v46   ;;  %v981_v46 = vsub.f32 %v3783_v14, %v3086_v5 }
 0x1cb   :  { %1316 = vperm.xlu1 %1569, %v969_v13   ;;  %v3784_v13 = vld [vmem:[#allocation12_spill] sm:$0xff] }
 0x1cc   :  { %v983_v57 = vsub.f32 %v3784_v13, %v3095_v21 }
 0x1ce   :  { %1361 = vperm.xlu0 %1570, %v978_v38  }
 0x1cf   :  { %1326 = vperm.xlu1 %1569, %v971_v39   ;;  %v985_v39 = vsub.f32 %v3785_v9, %v3101_v1 }
 0x1d2   :  { %1371 = vperm.xlu0 %1570, %v980_v31  }
 0x1d3   :  { %1336 = vperm.xlu1 %1569, %v973_v24  }
 0x1d4   :  { %v3169_v12 = vpop.permute.xlu0 %1008 }
 0x1d6   :  { %1381 = vperm.xlu0 %1570, %v982_v50  }
 0x1d7   :  { %1346 = vperm.xlu1 %1569, %v975_v63  }
 0x1d8   :  { %v3177_v60 = vpop.permute.xlu0 %1023 }
 0x1d9   :  { %v3181_v18 = vpop.permute.xlu1 %1003 }
 0x1da   :  { %1391 = vperm.xlu0 %1570, %v984_v2  }
 0x1db   :  { %1356 = vperm.xlu1 %1569, %v977_v8  }
 0x1dc   :  { %v3185_v37 = vpop.permute.xlu0 %1033 }
 0x1dd   :  { %v3189_v59 = vpop.permute.xlu1 %1013 }
 0x1de   :  { %1401 = vperm.xlu0 %1570, %v986_v20  }
 0x1df   :  { %1366 = vperm.xlu1 %1569, %v979_v44   ;;  %v1217_v44 = vmul.f32 %v1660_v48, %v3169_v12  ;;  %v1662_v12 = vld [vmem:[%s3645_s0 + $0x30] sm:$0xff]  ;;  %v1667_v48 = vld [vmem:[%s3645_s0 + $0x18] sm:$0xff] }
 0x1e0   :  { %v3193_v22 = vpop.permute.xlu0 %1043  ;;  %v1222_v9 = vmul.f32 %v1662_v12, %v3185_v37 }
 0x1e1   :  { %v3197_v26 = vpop.permute.xlu1 %1018 }
 0x1e2   :  { %1411 = vperm.xlu0 %1570, %v988_v54  }
 0x1e3   :  { %1376 = vperm.xlu1 %1569, %v981_v46   ;;  %v1661_v46 = vld [vmem:[%s3645_s0 + $0x20] sm:$0xff] }
 0x1e4   :  { %v3201_v11 = vpop.permute.xlu0 %1053 }
 0x1e5   :  { %v3205_v38 = vpop.permute.xlu1 %1028 }
 0x1e6   :  { %1421 = vperm.xlu0 %1570, %v990_v15   ;;  %v1220_v15 = vmul.f32 %v1661_v46, %v3177_v60 }
 0x1e7   :  { %1386 = vperm.xlu1 %1569, %v983_v57  }
 0x1e8   :  { %v3209_v5 = vpop.permute.xlu0 %1063 }
 0x1e9   :  { %v3213_v4 = vpop.permute.xlu1 %1038 }
 0x1ea   :  { %1431 = vperm.xlu0 %1570, %v992_v61  }
 0x1eb   :  { %1396 = vperm.xlu1 %1569, %v985_v39   ;;  %v1663_v39 = vld [vmem:[%s3645_s0] sm:$0xff] }
 0x1ec   :  { %v3217_v21 = vpop.permute.xlu0 %1073 }
 0x1ed   :  { %v3221_v31 = vpop.permute.xlu1 %1048 }
 0x1ee   :  { %1441 = vperm.xlu0 %1570, %v994_v34   ;;  %v1216_v34 = vmul.f32 %v1663_v39, %v3181_v18 }
 0x1ef   :  { %1406 = vperm.xlu1 %1569, %v987_v23  }
 0x1f0   :  { %v3225_v1 = vpop.permute.xlu0 %1083 }
 0x1f1   :  { %v3229_v53 = vpop.permute.xlu1 %1058 }
 0x1f2   :  { %1451 = vperm.xlu0 %1570, %v996_v16  }
 0x1f3   :  { %1416 = vperm.xlu1 %1569, %v989_v41   ;;  %v1664_v41 = vld [vmem:[%s3645_s0 + $0x40] sm:$0xff] }
 0x1f4   :  { %v3233_v3 = vpop.permute.xlu0 %1093  ;;  %v1224_v37 = vmul.f32 %v1664_v41, %v3193_v22  ;;  %v1672_v41 = vld [vmem:[%s3645_s0 + $0x80] sm:$0xff] }
 0x1f5   :  { %v3237_v28 = vpop.permute.xlu1 %1068 }
 0x1f6   :  { %1461 = vperm.xlu0 %1570, %v998_v56  }
 0x1f7   :  { %1426 = vperm.xlu1 %1569, %v991_v62  }
 0x1f8   :  { %v3241_v19 = vpop.permute.xlu0 %1103 }
 0x1f9   :  { %v3245_v51 = vpop.permute.xlu1 %1078 }
 0x1fa   :  { %1471 = vperm.xlu0 %1570, %v1000_v35   ;;  %v1665_v35 = vld [vmem:[%s3645_s0 + $0x10] sm:$0xff] }
 0x1fb   :  { %1436 = vperm.xlu1 %1569, %v993_v55   ;;  %v1218_v18 = vmul.f32 %v1665_v35, %v3189_v59 }
 0x1fc   :  { %v3247_v49 = vpop.permute.xlu0 %1113 }
 0x1fd   :  { %v3251_v17 = vpop.permute.xlu1 %1088 }
 0x1ff   :  { %1446 = vperm.xlu1 %1569, %v995_v52   ;;  %v1666_v52 = vld [vmem:[%s3645_s0 + $0x50] sm:$0xff] }
 0x200   :  { %v3253_v43 = vpop.permute.xlu0 %1123 }
 0x201   :  { %v3257_v7 = vpop.permute.xlu1 %1098 }
 0x203   :  { %1456 = vperm.xlu1 %1569, %v997_v42   ;;  %v1226_v42 = vmul.f32 %v1666_v52, %v3201_v11 }
 0x204   :  { %v3259_v33 = vpop.permute.xlu0 %1133 }
 0x205   :  { %v3263_v24 = vpop.permute.xlu1 %1108 }
 0x207   :  { %1466 = vperm.xlu1 %1569, %v999_v36  }
 0x208   :  { %v3265_v25 = vpop.permute.xlu0 %1143 }
 0x209   :  { %v3267_v32 = vpop.permute.xlu1 %1118 }
 0x20c   :  { %v3269_v58 = vpop.permute.xlu0 %1153 }
 0x20d   :  { %v3271_v50 = vpop.permute.xlu1 %1128 }
 0x210   :  { %v3273_v47 = vpop.permute.xlu0 %1163 }
 0x211   :  { %v3275_v40 = vpop.permute.xlu1 %1138 }
 0x214   :  { %v3277_v0 = vpop.permute.xlu0 %1173 }
 0x215   :  { %v3279_v63 = vpop.permute.xlu1 %1148 }
 0x218   :  { %v3281_v27 = vpop.permute.xlu0 %1183 }
 0x219   :  { %v3283_v30 = vpop.permute.xlu1 %1158 }
 0x21c   :  { %v3285_v6 = vpop.permute.xlu0 %1193 }
 0x21d   :  { %v3287_v2 = vpop.permute.xlu1 %1168 }
 0x220   :  { %v3289_v10 = vpop.permute.xlu0 %1203 }
 0x221   :  { %v3291_v8 = vpop.permute.xlu1 %1178 }
 0x224   :  { %v3293_v29 = vpop.permute.xlu0 %1213 }
 0x225   :  { %v3295_v20 = vpop.permute.xlu1 %1188 }
 0x229   :  { %v1267_v45 = vpop.permute.xlu0 %1266  ;;  %v3301_v54 = vpop.permute.xlu1 %1198 }
 0x22a   :  { %v1475_v14 = vadd.f32 %v1267_v45, %v1217_v44  ;;  %v1219_v44 = vmul.f32 %v1667_v48, %v3197_v26  ;;  %v1676_v48 = vld [vmem:[%s3645_s0 + $0xa0] sm:$0xff] }
 0x22c   :  { %1518 = vst.msk [vmem:[%s3647_s2 + $0x8] sm:$0xff] %vm54_vm0, %v1475_v14  ;;  %v1668_v14 = vld [vmem:[%s3645_s0 + $0x60] sm:$0xff] }
 0x22d   :  { %v1282_v13 = vpop.permute.xlu0 %1281  ;;  %v3311_v57 = vpop.permute.xlu1 %1208  ;;  %v1228_v46 = vmul.f32 %v1668_v14, %v3209_v5 }
 0x22e   :  { %v1478_v61 = vadd.f32 %v1282_v13, %v1220_v15  ;;  %v1669_v13 = vld [vmem:[%s3645_s0 + $0x28] sm:$0xff] }
 0x230   :  { %1521 = vst.msk [vmem:[%s3647_s2 + $0x20] sm:$0xff] %vm54_vm0, %v1478_v61  ;;  %v1221_v61 = vmul.f32 %v1669_v13, %v3205_v38 }
 0x231   :  { %v1292_v60 = vpop.permute.xlu0 %1291 }
 0x232   :  { %v1480_v23 = vadd.f32 %v1292_v60, %v1222_v9  ;;  %v1262_v16 = vpop.permute.xlu1 %1261  ;;  %v1670_v9 = vld [vmem:[%s3645_s0 + $0x70] sm:$0xff] }
 0x233   :  { %v1474_v56 = vadd.f32 %v1262_v16, %v1216_v34  ;;  %v1230_v60 = vmul.f32 %v1670_v9, %v3217_v21  ;;  %v1671_v34 = vld [vmem:[%s3645_s0 + $0x38] sm:$0xff]  ;;  %v1680_v9 = vld [vmem:[%s3645_s0 + $0xc0] sm:$0xff] }
 0x234   :  { %1523 = vst.msk [vmem:[%s3647_s2 + $0x30] sm:$0xff] %vm54_vm0, %v1480_v23  ;;  %v1223_v23 = vmul.f32 %v1671_v34, %v3213_v4 }
 0x235   :  { %v1302_v62 = vpop.permute.xlu0 %1301  ;;  %1517 = vst.msk [vmem:[%s3647_s2] sm:$0xff] %vm54_vm0, %v1474_v56 }
 0x236   :  { %v1482_v55 = vadd.f32 %v1302_v62, %v1224_v37  ;;  %v1272_v22 = vpop.permute.xlu1 %1271  ;;  %v1232_v37 = vmul.f32 %v1672_v41, %v3225_v1  ;;  %v1673_v62 = vld [vmem:[%s3645_s0 + $0x48] sm:$0xff] }
 0x237   :  { %v1476_v36 = vadd.f32 %v1272_v22, %v1218_v18  ;;  %v1225_v35 = vmul.f32 %v1673_v62, %v3221_v31  ;;  %v1684_v62 = vld [vmem:[%s3645_s0 + $0xe0] sm:$0xff] }
 0x238   :  { %1525 = vst.msk [vmem:[%s3647_s2 + $0x40] sm:$0xff] %vm54_vm0, %v1482_v55  ;;  %v1674_v55 = vld [vmem:[%s3645_s0 + $0x90] sm:$0xff] }
 0x239   :  { %v1312_v59 = vpop.permute.xlu0 %1311  ;;  %1519 = vst.msk [vmem:[%s3647_s2 + $0x10] sm:$0xff] %vm54_vm0, %v1476_v36  ;;  %v1234_v22 = vmul.f32 %v1674_v55, %v3233_v3 }
 0x23a   :  { %v1484_v45 = vadd.f32 %v1312_v59, %v1226_v42  ;;  %v1277_v11 = vpop.permute.xlu1 %1276  ;;  %v1675_v42 = vld [vmem:[%s3645_s0 + $0x58] sm:$0xff] }
 0x23b   :  { %v1477_v15 = vadd.f32 %v1277_v11, %v1219_v44  ;;  %v1227_v36 = vmul.f32 %v1675_v42, %v3229_v53  ;;  %v1236_v44 = vmul.f32 %v1676_v48, %v3241_v19  ;;  %v1677_v11 = vld [vmem:[%s3645_s0 + $0x68] sm:$0xff]  ;;  %v1688_v48 = vld [vmem:[%s3645_s0 + $0x100] sm:$0xff] }
 0x23c   :  { %1527 = vst.msk [vmem:[%s3647_s2 + $0x50] sm:$0xff] %vm54_vm0, %v1484_v45  ;;  %v1229_v14 = vmul.f32 %v1677_v11, %v3237_v28 }
 0x23d   :  { %v1322_v26 = vpop.permute.xlu0 %1321  ;;  %1520 = vst.msk [vmem:[%s3647_s2 + $0x18] sm:$0xff] %vm54_vm0, %v1477_v15  ;;  %v1678_v15 = vld [vmem:[%s3645_s0 + $0xb0] sm:$0xff] }
 0x23e   :  { %v1486_v12 = vadd.f32 %v1322_v26, %v1228_v46  ;;  %v1287_v5 = vpop.permute.xlu1 %1286  ;;  %v1238_v26 = vmul.f32 %v1678_v15, %v3247_v49 }
 0x23f   :  { %v1479_v39 = vadd.f32 %v1287_v5, %v1221_v61  ;;  %v1679_v61 = vld [vmem:[%s3645_s0 + $0x78] sm:$0xff] }
 0x240   :  { %1529 = vst.msk [vmem:[%s3647_s2 + $0x60] sm:$0xff] %vm54_vm0, %v1486_v12  ;;  %v1231_v12 = vmul.f32 %v1679_v61, %v3245_v51  ;;  %v1692_v61 = vld [vmem:[%s3645_s0 + $0x120] sm:$0xff] }
 0x241   :  { %v1332_v38 = vpop.permute.xlu0 %1331  ;;  %1522 = vst.msk [vmem:[%s3647_s2 + $0x28] sm:$0xff] %vm54_vm0, %v1479_v39 }
 0x242   :  { %v1488_v16 = vadd.f32 %v1332_v38, %v1230_v60  ;;  %v1297_v21 = vpop.permute.xlu1 %1296  ;;  %v1240_v60 = vmul.f32 %v1680_v9, %v3253_v43  ;;  %v1681_v38 = vld [vmem:[%s3645_s0 + $0x88] sm:$0xff] }
 0x243   :  { %v1481_v56 = vadd.f32 %v1297_v21, %v1223_v23  ;;  %v1233_v34 = vmul.f32 %v1681_v38, %v3251_v17 }
 0x244   :  { %1531 = vst.msk [vmem:[%s3647_s2 + $0x70] sm:$0xff] %vm54_vm0, %v1488_v16  ;;  %v1682_v16 = vld [vmem:[%s3645_s0 + $0xd0] sm:$0xff] }
 0x245   :  { %v1342_v4 = vpop.permute.xlu0 %1341  ;;  %1524 = vst.msk [vmem:[%s3647_s2 + $0x38] sm:$0xff] %vm54_vm0, %v1481_v56  ;;  %v1242_v21 = vmul.f32 %v1682_v16, %v3259_v33  ;;  %v1696_v16 = vld [vmem:[%s3645_s0 + $0x140] sm:$0xff] }
 0x246   :  { %v1490_v18 = vadd.f32 %v1342_v4, %v1232_v37  ;;  %v1307_v1 = vpop.permute.xlu1 %1306  ;;  %v1683_v37 = vld [vmem:[%s3645_s0 + $0x98] sm:$0xff] }
 0x247   :  { %v1483_v52 = vadd.f32 %v1307_v1, %v1225_v35  ;;  %v1235_v56 = vmul.f32 %v1683_v37, %v3257_v7  ;;  %v1244_v35 = vmul.f32 %v1684_v62, %v3265_v25  ;;  %v1685_v1 = vld [vmem:[%s3645_s0 + $0xa8] sm:$0xff] }
 0x248   :  { %1533 = vst.msk [vmem:[%s3647_s2 + $0x80] sm:$0xff] %vm54_vm0, %v1490_v18  ;;  %v1237_v55 = vmul.f32 %v1685_v1, %v3263_v24 }
 0x249   :  { %v1352_v31 = vpop.permute.xlu0 %1351  ;;  %1526 = vst.msk [vmem:[%s3647_s2 + $0x48] sm:$0xff] %vm54_vm0, %v1483_v52  ;;  %v1686_v52 = vld [vmem:[%s3645_s0 + $0xf0] sm:$0xff] }
 0x24a   :  { %v1492_v59 = vadd.f32 %v1352_v31, %v1234_v22  ;;  %v1317_v3 = vpop.permute.xlu1 %1316  ;;  %v1246_v31 = vmul.f32 %v1686_v52, %v3269_v58  ;;  %v1701_v52 = vld [vmem:[%s3645_s0 + $0x138] sm:$0xff] }
 0x24b   :  { %v1485_v45 = vadd.f32 %v1317_v3, %v1227_v36  ;;  %v1687_v36 = vld [vmem:[%s3645_s0 + $0xb8] sm:$0xff] }
 0x24c   :  { %1535 = vst.msk [vmem:[%s3647_s2 + $0x90] sm:$0xff] %vm54_vm0, %v1492_v59  ;;  %v1239_v59 = vmul.f32 %v1687_v36, %v3267_v32 }
 0x24d   :  { %v1362_v53 = vpop.permute.xlu0 %1361  ;;  %1528 = vst.msk [vmem:[%s3647_s2 + $0x58] sm:$0xff] %vm54_vm0, %v1485_v45 }
 0x24e   :  { %v1494_v46 = vadd.f32 %v1362_v53, %v1236_v44  ;;  %v1327_v19 = vpop.permute.xlu1 %1326  ;;  %v1248_v44 = vmul.f32 %v1688_v48, %v3273_v47  ;;  %v1689_v53 = vld [vmem:[%s3645_s0 + $0xc8] sm:$0xff] }
 0x24f   :  { %v1487_v13 = vadd.f32 %v1327_v19, %v1229_v14  ;;  %v1241_v11 = vmul.f32 %v1689_v53, %v3271_v50 }
 0x250   :  { %1537 = vst.msk [vmem:[%s3647_s2 + $0xa0] sm:$0xff] %vm54_vm0, %v1494_v46  ;;  %v1690_v46 = vld [vmem:[%s3645_s0 + $0x110] sm:$0xff] }
 0x251   :  { %v1372_v28 = vpop.permute.xlu0 %1371  ;;  %1530 = vst.msk [vmem:[%s3647_s2 + $0x68] sm:$0xff] %vm54_vm0, %v1487_v13  ;;  %v1250_v19 = vmul.f32 %v1690_v46, %v3277_v0 }
 0x252   :  { %v1496_v5 = vadd.f32 %v1372_v28, %v1238_v26  ;;  %v1337_v49 = vpop.permute.xlu1 %1336  ;;  %v1691_v26 = vld [vmem:[%s3645_s0 + $0xd8] sm:$0xff] }
 0x253   :  { %v1489_v39 = vadd.f32 %v1337_v49, %v1231_v12  ;;  %v1243_v13 = vmul.f32 %v1691_v26, %v3275_v40  ;;  %v1252_v12 = vmul.f32 %v1692_v61, %v3281_v27  ;;  %v1693_v49 = vld [vmem:[%s3645_s0 + $0xe8] sm:$0xff] }
 0x254   :  { %1539 = vst.msk [vmem:[%s3647_s2 + $0xb0] sm:$0xff] %vm54_vm0, %v1496_v5  ;;  %v1245_v9 = vmul.f32 %v1693_v49, %v3279_v63 }
 0x255   :  { %v1382_v51 = vpop.permute.xlu0 %1381  ;;  %1532 = vst.msk [vmem:[%s3647_s2 + $0x78] sm:$0xff] %vm54_vm0, %v1489_v39  ;;  %v1694_v39 = vld [vmem:[%s3645_s0 + $0x130] sm:$0xff] }
 0x256   :  { %v1498_v23 = vadd.f32 %v1382_v51, %v1240_v60  ;;  %v1347_v43 = vpop.permute.xlu1 %1346  ;;  %v1254_v51 = vmul.f32 %v1694_v39, %v3285_v6 }
 0x257   :  { %v1491_v41 = vadd.f32 %v1347_v43, %v1233_v34  ;;  %v1695_v34 = vld [vmem:[%s3645_s0 + $0xf8] sm:$0xff] }
 0x258   :  { %1541 = vst.msk [vmem:[%s3647_s2 + $0xc0] sm:$0xff] %vm54_vm0, %v1498_v23  ;;  %v1247_v23 = vmul.f32 %v1695_v34, %v3283_v30 }
 0x259   :  { %v1392_v17 = vpop.permute.xlu0 %1391  ;;  %1534 = vst.msk [vmem:[%s3647_s2 + $0x88] sm:$0xff] %vm54_vm0, %v1491_v41 }
 0x25a   :  { %v1500_v4 = vadd.f32 %v1392_v17, %v1242_v21  ;;  %v1357_v33 = vpop.permute.xlu1 %1356  ;;  %v1256_v21 = vmul.f32 %v1696_v16, %v3289_v10  ;;  %v1697_v17 = vld [vmem:[%s3645_s0 + $0x108] sm:$0xff] }
 0x25b   :  { %v1493_v18 = vadd.f32 %v1357_v33, %v1235_v56  ;;  %v1249_v37 = vmul.f32 %v1697_v17, %v3287_v2 }
 0x25c   :  { %1543 = vst.msk [vmem:[%s3647_s2 + $0xd0] sm:$0xff] %vm54_vm0, %v1500_v4  ;;  %v1698_v4 = vld [vmem:[%s3645_s0 + $0x150] sm:$0xff] }
 0x25d   :  { %v1402_v7 = vpop.permute.xlu0 %1401  ;;  %1536 = vst.msk [vmem:[%s3647_s2 + $0x98] sm:$0xff] %vm54_vm0, %v1493_v18  ;;  %v1258_v33 = vmul.f32 %v1698_v4, %v3293_v29 }
 0x25e   :  { %v1502_v22 = vadd.f32 %v1402_v7, %v1244_v35  ;;  %v1367_v25 = vpop.permute.xlu1 %1366  ;;  %v1699_v35 = vld [vmem:[%s3645_s0 + $0x118] sm:$0xff] }
 0x25f   :  { %v1495_v42 = vadd.f32 %v1367_v25, %v1237_v55  ;;  %v1251_v18 = vmul.f32 %v1699_v35, %v3291_v8  ;;  %v1700_v55 = vld [vmem:[%s3645_s0 + $0x128] sm:$0xff] }
 0x260   :  { %1545 = vst.msk [vmem:[%s3647_s2 + $0xe0] sm:$0xff] %vm54_vm0, %v1502_v22  ;;  %v1253_v22 = vmul.f32 %v1700_v55, %v3295_v20 }
 0x261   :  { %v1412_v24 = vpop.permute.xlu0 %1411  ;;  %1538 = vst.msk [vmem:[%s3647_s2 + $0xa8] sm:$0xff] %vm54_vm0, %v1495_v42 }
 0x262   :  { %v1504_v3 = vadd.f32 %v1412_v24, %v1246_v31  ;;  %v1377_v58 = vpop.permute.xlu1 %1376  ;;  %v1255_v31 = vmul.f32 %v1701_v52, %v3301_v54  ;;  %v1702_v24 = vld [vmem:[%s3645_s0 + $0x148] sm:$0xff] }
 0x263   :  { %v1497_v45 = vadd.f32 %v1377_v58, %v1239_v59  ;;  %v1257_v36 = vmul.f32 %v1702_v24, %v3311_v57 }
 0x264   :  { %1547 = vst.msk [vmem:[%s3647_s2 + $0xf0] sm:$0xff] %vm54_vm0, %v1504_v3 }
 0x265   :  { %v1422_v32 = vpop.permute.xlu0 %1421  ;;  %1540 = vst.msk [vmem:[%s3647_s2 + $0xb8] sm:$0xff] %vm54_vm0, %v1497_v45 }
 0x266   :  { %v1506_v14 = vadd.f32 %v1422_v32, %v1248_v44  ;;  %v1387_v47 = vpop.permute.xlu1 %1386 }
 0x267   :  { %v1499_v15 = vadd.f32 %v1387_v47, %v1241_v11 }
 0x268   :  { %1549 = vst.msk [vmem:[%s3647_s2 + $0x100] sm:$0xff] %vm54_vm0, %v1506_v14 }
 0x269   :  { %v1432_v50 = vpop.permute.xlu0 %1431  ;;  %1542 = vst.msk [vmem:[%s3647_s2 + $0xc8] sm:$0xff] %vm54_vm0, %v1499_v15 }
 0x26a   :  { %v1508_v28 = vadd.f32 %v1432_v50, %v1250_v19  ;;  %v1397_v0 = vpop.permute.xlu1 %1396 }
 0x26b   :  { %v1501_v5 = vadd.f32 %v1397_v0, %v1243_v13 }
 0x26c   :  { %1551 = vst.msk [vmem:[%s3647_s2 + $0x110] sm:$0xff] %vm54_vm0, %v1508_v28 }
 0x26d   :  { %v1442_v40 = vpop.permute.xlu0 %1441  ;;  %1544 = vst.msk [vmem:[%s3647_s2 + $0xd8] sm:$0xff] %vm54_vm0, %v1501_v5 }
 0x26e   :  { %v1510_v60 = vadd.f32 %v1442_v40, %v1252_v12  ;;  %v1407_v27 = vpop.permute.xlu1 %1406 }
 0x26f   :  { %v1503_v38 = vadd.f32 %v1407_v27, %v1245_v9 }
 0x270   :  { %1553 = vst.msk [vmem:[%s3647_s2 + $0x120] sm:$0xff] %vm54_vm0, %v1510_v60 }
 0x271   :  { %v1452_v63 = vpop.permute.xlu0 %1451  ;;  %1546 = vst.msk [vmem:[%s3647_s2 + $0xe8] sm:$0xff] %vm54_vm0, %v1503_v38 }
 0x272   :  { %v1512_v43 = vadd.f32 %v1452_v63, %v1254_v51  ;;  %v1417_v6 = vpop.permute.xlu1 %1416 }
 0x273   :  { %v1505_v41 = vadd.f32 %v1417_v6, %v1247_v23 }
 0x274   :  { %1555 = vst.msk [vmem:[%s3647_s2 + $0x130] sm:$0xff] %vm54_vm0, %v1512_v43 }
 0x275   :  { %v1462_v30 = vpop.permute.xlu0 %1461  ;;  %1548 = vst.msk [vmem:[%s3647_s2 + $0xf8] sm:$0xff] %vm54_vm0, %v1505_v41 }
 0x276   :  { %v1514_v56 = vadd.f32 %v1462_v30, %v1256_v21  ;;  %v1427_v10 = vpop.permute.xlu1 %1426 }
 0x277   :  { %v1507_v62 = vadd.f32 %v1427_v10, %v1249_v37 }
 0x278   :  { %1557 = vst.msk [vmem:[%s3647_s2 + $0x140] sm:$0xff] %vm54_vm0, %v1514_v56 }
 0x279   :  { %v1472_v2 = vpop.permute.xlu0 %1471  ;;  %1550 = vst.msk [vmem:[%s3647_s2 + $0x108] sm:$0xff] %vm54_vm0, %v1507_v62 }
 0x27a   :  { %v1516_v7 = vadd.f32 %v1472_v2, %v1258_v33  ;;  %v1437_v29 = vpop.permute.xlu1 %1436 }
 0x27b   :  { %v1509_v1 = vadd.f32 %v1437_v29, %v1251_v18 }
 0x27c   :  { %1559 = vst.msk [vmem:[%s3647_s2 + $0x150] sm:$0xff] %vm54_vm0, %v1516_v7 }
 0x27d   :  { %1552 = vst.msk [vmem:[%s3647_s2 + $0x118] sm:$0xff] %vm54_vm0, %v1509_v1 }
 0x27e   :  { %v1447_v8 = vpop.permute.xlu1 %1446 }
 0x27f   :  { %v1511_v25 = vadd.f32 %v1447_v8, %v1253_v22 }
 0x281   :  { %1554 = vst.msk [vmem:[%s3647_s2 + $0x128] sm:$0xff] %vm54_vm0, %v1511_v25 }
 0x282   :  { %v1457_v42 = vpop.permute.xlu1 %1456 }
 0x283   :  { %v1513_v20 = vadd.f32 %v1457_v42, %v1255_v31 }
 0x285   :  { %1556 = vst.msk [vmem:[%s3647_s2 + $0x138] sm:$0xff] %vm54_vm0, %v1513_v20 }
 0x286   :  { %v1467_v59 = vpop.permute.xlu1 %1466 }
 0x287   :  { %v1515_v54 = vadd.f32 %v1467_v59, %v1257_v36 }
 0x289   :  { %1558 = vst.msk [vmem:[%s3647_s2 + $0x148] sm:$0xff] %vm54_vm0, %v1515_v54 }

</bundles_post_ra>
